<compile_context>
chip_gen: v6e
topology: v6e:2x2x1
jax: 0.10.0
libtpu: 0.0.40
codegen_flags: <defaults>
</compile_context>

<pallas_src>
import functools

import numpy as np
import jax
import jax.numpy as jnp
from jax.experimental import pallas as pl
from jax.experimental.pallas import tpu as pltpu

_LANE = 128
_DEFAULT_VMEM_BYTES = 64 << 20          # v7x per-TC VMEM (most restrictive gen)
_BUFFERED1_MIN_BYTES = 512 * 1024       # only bother single-buffering big consts
_MAX_BLOCK_B = 4096                     # default batch-tile cap (sweep 2048-8192)


def _round_up(x, m):
    return ((x + m - 1) // m) * m


def _vmem_capacity_bytes():
    """Per-core VMEM capacity (generation-aware) with a conservative fallback."""
    try:
        return int(pltpu.get_tpu_info().vmem_capacity_bytes)
    except Exception:
        return _DEFAULT_VMEM_BYTES


def _const_spec(shape, index_map, nbytes):
    """BlockSpec for a grid-invariant operand.

    Large constants are single-buffered (pl.Buffered(1)): their block index
    never changes, so double-buffering only doubles VMEM residency.  Small
    constants (and older JAX without pipeline_mode) use the default spec.
    """
    if nbytes >= _BUFFERED1_MIN_BYTES and hasattr(pl, "Buffered"):
        try:
            return pl.BlockSpec(shape, index_map, pipeline_mode=pl.Buffered(1))
        except TypeError:
            pass
    return pl.BlockSpec(shape, index_map)


def _mlp_kernel(x_ref, w1_ref, b1_ref, w2_ref, b2_ref, w3_ref, b3_ref, o_ref,
                acc_ref, *, precision):
    """One (batch-tile, d_in-tile) grid step of the fused 3-layer MLP.

    acc_ref: f32 VMEM scratch holding the partial fc1 pre-activation for the
    current batch tile (accumulated over the "arbitrary" d_in axis).
    """
    k = pl.program_id(1)

    @pl.when(k == 0)
    def _init():
        acc_ref[...] = jnp.zeros_like(acc_ref)

    # fc1 partial product for this d_in slice; f32 MXU accumulation.
    acc_ref[...] += jnp.dot(x_ref[...], w1_ref[...],
                            preferred_element_type=jnp.float32,
                            precision=precision)

    @pl.when(k == pl.num_programs(1) - 1)
    def _finalize():
        # Bias-add + ReLU in f32 on the VPU (v5e-safe, matches f32 reference).
        h1 = jnp.maximum(acc_ref[...] + b1_ref[...], 0.0)
        h2 = jnp.dot(h1.astype(w2_ref.dtype), w2_ref[...],
                     preferred_element_type=jnp.float32, precision=precision)
        h2 = jnp.maximum(h2 + b2_ref[...], 0.0)
        h3 = jnp.dot(h2.astype(w3_ref.dtype), w3_ref[...],
                     preferred_element_type=jnp.float32, precision=precision)
        o_ref[...] = (h3 + b3_ref[...]).astype(o_ref.dtype)


@functools.partial(
    jax.jit,
    static_argnames=("block_b", "block_k", "b_pad", "d_in_pad",
                     "compute_dtype", "vmem_usable"))
def _mlp_forward_impl(x, w1, b1, w2, b2, w3, b3, *, block_b, block_k, b_pad,
                      d_in_pad, compute_dtype, vmem_usable):
    B, d_in = x.shape
    h1_dim = w1.shape[1]
    h2_dim = w2.shape[1]
    d_out = w3.shape[1]
    out_dtype = x.dtype
    itemsize_c = np.dtype(compute_dtype).itemsize

    # Biases stay f32 (added to the f32 accumulator).
    b1 = b1.reshape(1, h1_dim).astype(jnp.float32)
    b2 = b2.reshape(1, h2_dim).astype(jnp.float32)
    b3 = b3.reshape(1, d_out).astype(jnp.float32)

    # bf16 (or other) matmul-input fast path: cast ONCE here so the kernel
    # streams fewer HBM bytes and does no per-step VPU casts.
    x = x.astype(compute_dtype)
    w1 = w1.astype(compute_dtype)
    w2 = w2.astype(compute_dtype)
    w3 = w3.astype(compute_dtype)

    # Zero-pad batch / d_in up to the tile grid (zero rows are sliced off and
    # zero d_in columns contribute nothing to the matmul).
    if b_pad != B or d_in_pad != d_in:
        x = jnp.pad(x, ((0, b_pad - B), (0, d_in_pad - d_in)))
    if d_in_pad != d_in:
        w1 = jnp.pad(w1, ((0, d_in_pad - d_in), (0, 0)))

    num_b_blocks = b_pad // block_b
    num_k_blocks = d_in_pad // block_k

    precision = (jax.lax.Precision.HIGHEST
                 if np.dtype(compute_dtype) == np.dtype(jnp.float32)
                 else jax.lax.Precision.DEFAULT)

    flops = 2 * b_pad * (d_in_pad * h1_dim + h1_dim * h2_dim + h2_dim * d_out)
    bytes_accessed = (
        itemsize_c * (b_pad * d_in_pad + d_in_pad * h1_dim
                      + h1_dim * h2_dim + h2_dim * d_out)
        + 4 * (b_pad * d_out + h1_dim + h2_dim + d_out))

    # VMEM budget: double-buffered x/out tiles + weight tiles + f32 fc1
    # accumulator scratch + live intermediates, with 2x headroom, capped by
    # the generation-aware usable VMEM (physical minus ~20% Mosaic headroom).
    vmem_est = (
        2 * block_b * block_k * itemsize_c            # x tiles (double-buffered)
        + 2 * block_b * d_out * 4                     # out tiles
        + 2 * block_k * h1_dim * itemsize_c           # w1 tile(s)
        + (h1_dim * h2_dim + h2_dim * d_out) * itemsize_c
        + (h1_dim + h2_dim + d_out) * 4
        + block_b * h1_dim * 4                        # fc1 accumulator scratch
        + block_b * (h1_dim + h2_dim) * 4)            # live h1/h2 intermediates
    vmem_limit = int(min(max(2 * vmem_est, 32 << 20), vmem_usable))

    const_idx = lambda i, k: (0, 0)
    if num_k_blocks == 1:
        w1_spec = _const_spec((block_k, h1_dim), lambda i, k: (k, 0),
                              block_k * h1_dim * itemsize_c)
    else:
        w1_spec = pl.BlockSpec((block_k, h1_dim), lambda i, k: (k, 0))

    out = pl.pallas_call(
        functools.partial(_mlp_kernel, precision=precision),
        out_shape=jax.ShapeDtypeStruct((b_pad, d_out), out_dtype),
        grid_spec=pltpu.PrefetchScalarGridSpec(
            num_scalar_prefetch=0,
            grid=(num_b_blocks, num_k_blocks),
            in_specs=[
                pl.BlockSpec((block_b, block_k), lambda i, k: (i, k)),    # x
                w1_spec,                                                  # w1
                _const_spec((1, h1_dim), const_idx, h1_dim * 4),          # b1
                _const_spec((h1_dim, h2_dim), const_idx,
                            h1_dim * h2_dim * itemsize_c),                # w2
                _const_spec((1, h2_dim), const_idx, h2_dim * 4),          # b2
                _const_spec((h2_dim, d_out), const_idx,
                            h2_dim * d_out * itemsize_c),                 # w3
                _const_spec((1, d_out), const_idx, d_out * 4),            # b3
            ],
            out_specs=pl.BlockSpec((block_b, d_out), lambda i, k: (i, 0)),
            scratch_shapes=[pltpu.VMEM((block_b, h1_dim), jnp.float32)],
        ),
        compiler_params=pltpu.CompilerParams(
            dimension_semantics=("parallel", "arbitrary"),
            vmem_limit_bytes=vmem_limit,
        ),
        cost_estimate=pl.CostEstimate(
            flops=flops, transcendentals=0, bytes_accessed=bytes_accessed),
    )(x, w1, b1, w2, b2, w3, b3)

    return out[:B]


def mlp_forward(x, w1, b1, w2, b2, w3, b3, *, block_b=None, block_k=None,
                compute_dtype=jnp.float32):
    """Fused fc1->ReLU->fc2->ReLU->fc3 forward (matches the PyTorch module)."""
    B, d_in = x.shape
    h1_dim = w1.shape[1]
    compute_dtype = np.dtype(compute_dtype)
    itemsize_c = compute_dtype.itemsize

    vmem_usable = int(_vmem_capacity_bytes() * 0.8)   # ~20% Mosaic headroom

    # Batch tiling: big tiles amortize per-grid-step overhead; small batches
    # are not inflated; keep >= 2 blocks when possible for v7x's 2 TCs.
    b_round = _round_up(B, _LANE)
    if block_b is None:
        block_b = min(_MAX_BLOCK_B,
                      max(_LANE, _round_up((b_round + 1) // 2, _LANE)))
    assert block_b % _LANE == 0, "block_b must be a multiple of 128"
    num_b_blocks = pl.cdiv(B, block_b)
    b_pad = num_b_blocks * block_b

    # Reduction (d_in) tiling: split only when w1 would hog VMEM (matters
    # first on v7x's 64 MiB; v5e/v6e's 128 MiB tolerates ~2x larger d_in).
    if block_k is None:
        w1_budget = max(vmem_usable // 8, 4 << 20)
        if d_in * h1_dim * itemsize_c <= w1_budget:
            block_k = d_in
        else:
            block_k = max(_LANE,
                          (w1_budget // (h1_dim * itemsize_c)) // _LANE * _LANE)
    if block_k != d_in:
        assert block_k % _LANE == 0, "split block_k must be a multiple of 128"
    num_k_blocks = pl.cdiv(d_in, block_k)
    d_in_pad = num_k_blocks * block_k

    return _mlp_forward_impl(
        x, w1, b1, w2, b2, w3, b3,
        block_b=block_b, block_k=block_k, b_pad=b_pad, d_in_pad=d_in_pad,
        compute_dtype=compute_dtype, vmem_usable=vmem_usable)


def init_params(key, input_size, h1=128, h2=32, d_out=1):
    """PyTorch nn.Linear-style init: U[-1/sqrt(fan_in), +1/sqrt(fan_in)]."""
    dims = [(input_size, h1), (h1, h2), (h2, d_out)]
    params = []
    for i, (fan_in, fan_out) in enumerate(dims):
        kw, kb = jax.random.split(jax.random.fold_in(key, i))
        bound = 1.0 / float(fan_in) ** 0.5
        w = jax.random.uniform(kw, (fan_in, fan_out), jnp.float32, -bound, bound)
        b = jax.random.uniform(kb, (1, fan_out), jnp.float32, -bound, bound)
        params += [w, b]
    return params


def reference(xv, params):
    w1, b1, w2, b2, w3, b3 = params
    hp = lambda a, b: jnp.dot(a, b, precision=jax.lax.Precision.HIGHEST)
    r = jnp.maximum(hp(xv, w1) + b1, 0.0)
    r = jnp.maximum(hp(r, w2) + b2, 0.0)
    return hp(r, w3) + b3


if __name__ == "__main__":
    key = jax.random.PRNGKey(0)
    kx, kp = jax.random.split(key)

    # Case 1: f32, ragged batch (200), adaptive tile -> 2 "parallel" blocks.
    input_size = 32
    p1 = init_params(kp, input_size)
    x1 = jax.random.normal(kx, (200, input_size), jnp.float32)
    out1 = jax.block_until_ready(mlp_forward(x1, *p1))
    ref1 = reference(x1, p1)
    assert out1.shape == (200, 1)
    assert jnp.allclose(out1, ref1, atol=1e-4, rtol=1e-4), \
        float(jnp.max(jnp.abs(out1 - ref1)))

    # Case 2: bf16 matmul-input fast path (x/weights cast in wrapper),
    # f32 accumulate / bias / ReLU.
    x2 = jax.random.normal(jax.random.fold_in(kx, 1), (64, input_size),
                           jnp.float32)
    out2 = jax.block_until_ready(
        mlp_forward(x2, *p1, compute_dtype=jnp.bfloat16))
    ref2 = reference(x2, p1)
    assert out2.shape == (64, 1)
    assert jnp.allclose(out2, ref2, atol=5e-2, rtol=5e-2)

    # Case 3: forced K-split over d_in (2 "arbitrary" reduction steps with the
    # f32 VMEM accumulator), 2 batch blocks.
    input_size3 = 256
    p3 = init_params(jax.random.fold_in(kp, 7), input_size3)
    x3 = jax.random.normal(jax.random.fold_in(kx, 2), (160, input_size3),
                           jnp.float32)
    out3 = jax.block_until_ready(
        mlp_forward(x3, *p3, block_b=128, block_k=128))
    ref3 = reference(x3, p3)
    assert out3.shape == (160, 1)
    assert jnp.allclose(out3, ref3, atol=1e-4, rtol=1e-4), \
        float(jnp.max(jnp.abs(out3 - ref3)))

    print("KERNEL_OK")
</pallas_src>

<mosaic_0001>
module attributes {stable_mosaic.version = 11 : i64} {
  func.func @_mlp_kernel(%arg0: i32, %arg1: i32, %arg2: memref<128x32xf32, #tpu.memory_space<vmem>>, %arg3: memref<32x128xf32, #tpu.memory_space<vmem>>, %arg4: memref<1x128xf32, #tpu.memory_space<vmem>>, %arg5: memref<128x32xf32, #tpu.memory_space<vmem>>, %arg6: memref<1x32xf32, #tpu.memory_space<vmem>>, %arg7: memref<32x1xf32, #tpu.memory_space<vmem>>, %arg8: memref<1x1xf32, #tpu.memory_space<vmem>>, %arg9: memref<128x1xf32, #tpu.memory_space<vmem>>, %arg10: memref<128x128xf32, #tpu.memory_space<vmem>>) attributes {dimension_semantics = [#tpu.dimension_semantics<parallel>, #tpu.dimension_semantics<arbitrary>], iteration_bounds = array<i64: 2, 1>, scalar_prefetch = 0 : i64, scratch_operands = 1 : i64, tpu.core_type = #tpu.core_type<tc>, window_params = [{transform_indices = @transform_0, window_bounds = array<i64: 128, 32>}, {transform_indices = @transform_1, window_bounds = array<i64: 32, 128>}, {pipeline_mode = #tpu.pipeline_mode<synchronous>, transform_indices = @transform_2, window_bounds = array<i64: 1, 128>}, {pipeline_mode = #tpu.pipeline_mode<synchronous>, transform_indices = @transform_3, window_bounds = array<i64: 128, 32>}, {pipeline_mode = #tpu.pipeline_mode<synchronous>, transform_indices = @transform_4, window_bounds = array<i64: 1, 32>}, {pipeline_mode = #tpu.pipeline_mode<synchronous>, transform_indices = @transform_5, window_bounds = array<i64: 32, 1>}, {pipeline_mode = #tpu.pipeline_mode<synchronous>, transform_indices = @transform_6, window_bounds = array<i64: 1, 1>}, {transform_indices = @transform_7, window_bounds = array<i64: 128, 1>}]} {
    %c0_i32 = arith.constant 0 : i32
    %0 = arith.cmpi eq, %arg1, %c0_i32 : i32
    %1 = arith.extui %0 : i1 to i32
    %c0_i32_0 = arith.constant 0 : i32
    %2 = arith.cmpi ne, %1, %c0_i32_0 : i32
    scf.if %2 {
      %cst_10 = arith.constant 0.000000e+00 : f32
      %12 = vector.broadcast %cst_10 : f32 to vector<128x128xf32>
      %c0_11 = arith.constant 0 : index
      %c0_12 = arith.constant 0 : index
      %13 = vector.load %arg10[%c0_11, %c0_12] : memref<128x128xf32, #tpu.memory_space<vmem>>, vector<128x128xf32>
      tpu.vector_store %arg10[%c0_11, %c0_12], %12 {strides = array<i32>} : memref<128x128xf32, #tpu.memory_space<vmem>>, vector<128x128xf32>,
    } else {
    }
    %c0 = arith.constant 0 : index
    %c0_1 = arith.constant 0 : index
    %3 = vector.load %arg10[%c0, %c0_1] : memref<128x128xf32, #tpu.memory_space<vmem>>, vector<128x128xf32>
    %c0_2 = arith.constant 0 : index
    %c0_3 = arith.constant 0 : index
    %4 = vector.load %arg2[%c0_2, %c0_3] : memref<128x32xf32, #tpu.memory_space<vmem>>, vector<128x32xf32>
    %c0_4 = arith.constant 0 : index
    %c0_5 = arith.constant 0 : index
    %5 = vector.load %arg3[%c0_4, %c0_5] : memref<32x128xf32, #tpu.memory_space<vmem>>, vector<32x128xf32>
    %cst = arith.constant dense<0.000000e+00> : vector<128x128xf32>
    %6 = tpu.matmul %4, %5, %cst {dimension_numbers = #tpu.dot_dimension_numbers<[1], [0], [0], [1], [0, 0, 1, 1], [], []>, precision = #tpu.contract_precision<fp32>} : vector<128x32xf32>, vector<32x128xf32>, vector<128x128xf32> -> vector<128x128xf32>
    %7 = arith.addf %3, %6 : vector<128x128xf32>
    %c0_6 = arith.constant 0 : index
    %c0_7 = arith.constant 0 : index
    %8 = vector.load %arg10[%c0_6, %c0_7] : memref<128x128xf32, #tpu.memory_space<vmem>>, vector<128x128xf32>
    tpu.vector_store %arg10[%c0_6, %c0_7], %7 {strides = array<i32>} : memref<128x128xf32, #tpu.memory_space<vmem>>, vector<128x128xf32>,
    %c0_i32_8 = arith.constant 0 : i32
    %9 = arith.cmpi eq, %arg1, %c0_i32_8 : i32
    %10 = arith.extui %9 : i1 to i32
    %c0_i32_9 = arith.constant 0 : i32
    %11 = arith.cmpi ne, %10, %c0_i32_9 : i32
    scf.if %11 {
      %c0_10 = arith.constant 0 : index
      %c0_11 = arith.constant 0 : index
      %12 = vector.load %arg10[%c0_10, %c0_11] : memref<128x128xf32, #tpu.memory_space<vmem>>, vector<128x128xf32>
      %c0_12 = arith.constant 0 : index
      %c0_13 = arith.constant 0 : index
      %13 = vector.load %arg4[%c0_12, %c0_13] : memref<1x128xf32, #tpu.memory_space<vmem>>, vector<1x128xf32>
      %14 = vector.broadcast %13 : vector<1x128xf32> to vector<128x128xf32>
      %15 = arith.addf %12, %14 : vector<128x128xf32>
      %cst_14 = arith.constant 0.000000e+00 : f32
      %16 = vector.broadcast %cst_14 : f32 to vector<128x128xf32>
      %17 = arith.maximumf %15, %16 : vector<128x128xf32>
      %c0_15 = arith.constant 0 : index
      %c0_16 = arith.constant 0 : index
      %18 = vector.load %arg5[%c0_15, %c0_16] : memref<128x32xf32, #tpu.memory_space<vmem>>, vector<128x32xf32>
      %cst_17 = arith.constant dense<0.000000e+00> : vector<128x32xf32>
      %19 = tpu.matmul %17, %18, %cst_17 {dimension_numbers = #tpu.dot_dimension_numbers<[1], [0], [0], [1], [0, 0, 1, 1], [], []>, precision = #tpu.contract_precision<fp32>} : vector<128x128xf32>, vector<128x32xf32>, vector<128x32xf32> -> vector<128x32xf32>
      %c0_18 = arith.constant 0 : index
      %c0_19 = arith.constant 0 : index
      %20 = vector.load %arg6[%c0_18, %c0_19] : memref<1x32xf32, #tpu.memory_space<vmem>>, vector<1x32xf32>
      %21 = vector.broadcast %20 : vector<1x32xf32> to vector<128x32xf32>
      %22 = arith.addf %19, %21 : vector<128x32xf32>
      %cst_20 = arith.constant 0.000000e+00 : f32
      %23 = vector.broadcast %cst_20 : f32 to vector<128x32xf32>
      %24 = arith.maximumf %22, %23 : vector<128x32xf32>
      %c0_21 = arith.constant 0 : index
      %c0_22 = arith.constant 0 : index
      %25 = vector.load %arg7[%c0_21, %c0_22] : memref<32x1xf32, #tpu.memory_space<vmem>>, vector<32x1xf32>
      %cst_23 = arith.constant dense<0.000000e+00> : vector<128x1xf32>
      %26 = tpu.matmul %24, %25, %cst_23 {dimension_numbers = #tpu.dot_dimension_numbers<[1], [0], [0], [1], [0, 0, 1, 1], [], []>, precision = #tpu.contract_precision<fp32>} : vector<128x32xf32>, vector<32x1xf32>, vector<128x1xf32> -> vector<128x1xf32>
      %c0_24 = arith.constant 0 : index
      %c0_25 = arith.constant 0 : index
      %27 = vector.load %arg8[%c0_24, %c0_25] : memref<1x1xf32, #tpu.memory_space<vmem>>, vector<1x1xf32>
      %28 = vector.broadcast %27 : vector<1x1xf32> to vector<128x1xf32>
      %29 = arith.addf %26, %28 : vector<128x1xf32>
      %c0_26 = arith.constant 0 : index
      %c0_27 = arith.constant 0 : index
      %30 = vector.load %arg9[%c0_26, %c0_27] : memref<128x1xf32, #tpu.memory_space<vmem>>, vector<128x1xf32>
      tpu.vector_store %arg9[%c0_26, %c0_27], %29 {strides = array<i32>} : memref<128x1xf32, #tpu.memory_space<vmem>>, vector<128x1xf32>,
    } else {
    }
    return
  }
  func.func @transform_0(%arg0: i32, %arg1: i32) -> (i32, i32) {
    %c0_i32 = arith.constant 0 : i32
    return %arg0, %arg1 : i32, i32
  }
  func.func @transform_1(%arg0: i32, %arg1: i32) -> (i32, i32) {
    %c0_i32 = arith.constant 0 : i32
    %c0_i32_0 = arith.constant 0 : i32
    return %arg1, %c0_i32 : i32, i32
  }
  func.func @transform_2(%arg0: i32, %arg1: i32) -> (i32, i32) {
    %c0_i32 = arith.constant 0 : i32
    %c0_i32_0 = arith.constant 0 : i32
    %c0_i32_1 = arith.constant 0 : i32
    return %c0_i32, %c0_i32_0 : i32, i32
  }
  func.func @transform_3(%arg0: i32, %arg1: i32) -> (i32, i32) {
    %c0_i32 = arith.constant 0 : i32
    %c0_i32_0 = arith.constant 0 : i32
    %c0_i32_1 = arith.constant 0 : i32
    return %c0_i32, %c0_i32_0 : i32, i32
  }
  func.func @transform_4(%arg0: i32, %arg1: i32) -> (i32, i32) {
    %c0_i32 = arith.constant 0 : i32
    %c0_i32_0 = arith.constant 0 : i32
    %c0_i32_1 = arith.constant 0 : i32
    return %c0_i32, %c0_i32_0 : i32, i32
  }
  func.func @transform_5(%arg0: i32, %arg1: i32) -> (i32, i32) {
    %c0_i32 = arith.constant 0 : i32
    %c0_i32_0 = arith.constant 0 : i32
    %c0_i32_1 = arith.constant 0 : i32
    return %c0_i32, %c0_i32_0 : i32, i32
  }
  func.func @transform_6(%arg0: i32, %arg1: i32) -> (i32, i32) {
    %c0_i32 = arith.constant 0 : i32
    %c0_i32_0 = arith.constant 0 : i32
    %c0_i32_1 = arith.constant 0 : i32
    return %c0_i32, %c0_i32_0 : i32, i32
  }
  func.func @transform_7(%arg0: i32, %arg1: i32) -> (i32, i32) {
    %c0_i32 = arith.constant 0 : i32
    %c0_i32_0 = arith.constant 0 : i32
    return %arg0, %c0_i32 : i32, i32
  }
}

</mosaic_0001>

<bundles_post_ra>
// kernel: _mlp_forward_impl.1
= control target key start
LH: loop header
LB: loop body
LE: loop exit
PB: predicated region body
PF: predicated region fallthrough
CT: control target
= control target key end

     0   :  { %s5526_s26 = smov 0   ;;  %s5528_s27 = smov 0   ;;  %s7354_s0 = inlined_call_operand.vmem [shape: f32[256,32], index: 0, kind: input, shape index: {}]   ;;  %s7355_s1 = inlined_call_operand.vmem [shape: f32[32,128], index: 1, kind: input, shape index: {}]   ;;  %s7356_s2 = inlined_call_operand.vmem [shape: f32[1,128], index: 2, kind: input, shape index: {}]   ;;  %s7357_s3 = inlined_call_operand.vmem [shape: f32[128,32], index: 3, kind: input, shape index: {}]   ;;  %s7358_s4 = inlined_call_operand.vmem [shape: f32[1,32], index: 4, kind: input, shape index: {}]   ;;  %s7359_s5 = inlined_call_operand.vmem [shape: f32[32,1], index: 5, kind: input, shape index: {}]   ;;  %s7360_s6 = inlined_call_operand.<no memory space> [shape: f32[1,1], index: 6, kind: input, shape index: {}]   ;;  %s7361_s7 = inlined_call_operand.vmem [shape: f32[256,1], index: 7, kind: output, shape index: {}]  }
   0x1   :  { %v12_v0 = vstv %s7360_s6  ;;  %s5530_s28 = smov 0  }
   0x2   :  { %13 = vst [vmem:[#allocation3] sm:$0x1] %v12_v0 }
   0x3 LB: > { %s31_s6 = sadd.s32 1, %s5477_s27  ;;  %p4273_p0 = scmp.ge.s32.totalorder %s5481_s28, 1  ;;  %s5481_s28 = sphi %s5530_s28, %s19_s28   ;;  %s5477_s27 = sphi %s5528_s27, %s7679_s27   ;;  %s5473_s26 = sphi %s5526_s26, %s7678_s26  }
   0x4   : > { %p33_p1 = scmp.ge.s32.totalorder %s31_s6, 2  ;;  %p268_p2 = scmp.lt.s32.totalorder %s5481_s28, 3 }
   0x6   : > { %s7681_s6 = smov (%p33_p1, %s31_s6), 0  ;;  %p269_p3 = pnand %p4273_p0, %p268_p2 }
   0x8   : > { %272 = sbr.rel (%p269_p3) target bundleno = 914 (0x392), region = 48 }
   0xd   : > { %v384_v1 = vld [vmem:[%s7355_s1 + $0x18] sm:$0xff]  ;;  %v383_v2 = vld [vmem:[%s7355_s1 + $0x10] sm:$0xff]  ;;  %v382_v3 = vld [vmem:[%s7355_s1 + $0x8] sm:$0xff]  ;;  %s4274_s12 = sshll.u32 %s5473_s26, 4  ;;  %vm385_vm0 = vcmask 261120   ;;  %vm4168_vm1 = vcmask 7168  }
   0xe   : > { %v5553_v4 = vand.u32 4294901760, %v384_v1  ;;  %v5555_v5 = vand.u32 4294901760, %v383_v2  ;;  %v5557_v6 = vand.u32 4294901760, %v382_v3  ;;  %v381_v7 = vld [vmem:[%s7355_s1] sm:$0xff]  ;;  %p309_p4 = scmp.lt.s32.totalorder %s4274_s12, 31 }
   0xf   : > { %v5562_v8 = vand.u32 4294901760, %v381_v7 }
  0x10   : > { %4715 = vmatprep.subr.mxu0 %v5553_v4  ;;  %v5566_v9 = vsub.f32 %v384_v1, %v5553_v4  ;;  %v5569_v10 = vsub.f32 %v383_v2, %v5555_v5  ;;  %v5572_v11 = vsub.f32 %v382_v3, %v5557_v6  ;;  %s7683_s12 = smov (!%p309_p4, %s4274_s12), 31 }
  0x11   : > { %4716 = vmatpush3.msra.mxu0 %v5553_v4  ;;  %v5578_v12 = vsub.f32 %v381_v7, %v5562_v8  ;;  %s4275_s15 = sshll.u32 %s7683_s12, 3 }
  0x12   : > { %v5581_v13 = vand.u32 4294901760, %v5566_v9  ;;  %4717 = vmatprep.subr.mxu0 %v5555_v5  ;;  %v5585_v14 = vand.u32 4294901760, %v5569_v10  ;;  %v5588_v15 = vand.u32 4294901760, %v5572_v11  ;;  %s5600_s18 = scalar_lea.vmem %s7354_s0, %s4275_s15  ;;  %s7258_s29 = scalar_lea.vmem %s7361_s7, %s4275_s15 }
  0x13   : > { %4718 = vmatpush3.msra.mxu0 %v5555_v5  ;;  %v5593_v16 = vand.u32 4294901760, %v5578_v12  ;;  %v365_v20 = vld [vmem:[%s5600_s18] sm:$0xff]  ;;  %v366_v21 = vld [vmem:[%s5600_s18 + $0x8] sm:$0xff]  ;;  %v367_v22 = vld [vmem:[%s5600_s18 + $0x10] sm:$0xff] }
  0x14   : > { %v691_v17 = vsub.f32 %v5566_v9, %v5581_v13  ;;  %v698_v18 = vsub.f32 %v5569_v10, %v5585_v14  ;;  %4719 = vmatprep.subr.mxu0 %v5557_v6  ;;  %v705_v19 = vsub.f32 %v5572_v11, %v5588_v15  ;;  %v387_v24 = vsel %vm385_vm0, %v365_v20, 0  ;;  %v368_v27 = vld [vmem:[%s5600_s18 + $0x18] sm:$0xff]  ;;  %v369_v28 = vld [vmem:[%s5600_s18 + $0x20] sm:$0xff]  ;;  %v370_v29 = vld [vmem:[%s5600_s18 + $0x28] sm:$0xff] }
  0x15   : > { %4720 = vmatpush3.msra.mxu0 %v5557_v6  ;;  %v712_v23 = vsub.f32 %v5578_v12, %v5593_v16  ;;  %v390_v25 = vsel %vm385_vm0, %v366_v21, 0  ;;  %v393_v26 = vsel %vm385_vm0, %v367_v22, 0  ;;  %v5622_v33 = vand.u32 4294901760, %v387_v24  ;;  %v371_v38 = vld [vmem:[%s5600_s18 + $0x30] sm:$0xff]  ;;  %v372_v39 = vld [vmem:[%s5600_s18 + $0x38] sm:$0xff]  ;;  %v373_v0 = vld [vmem:[%s5600_s18 + $0x40] sm:$0xff] }
  0x16   : > { %v692_v30 = vand.u32 4294901760, %v691_v17  ;;  %v699_v31 = vand.u32 4294901760, %v698_v18  ;;  %v706_v32 = vand.u32 4294901760, %v705_v19  ;;  %4721 = vmatprep.subr.mxu0 %v5562_v8  ;;  %v5625_v35 = vand.u32 4294901760, %v390_v25  ;;  %v374_v17 = vld [vmem:[%s5600_s18 + $0x48] sm:$0xff]  ;;  %v375_v22 = vld [vmem:[%s5600_s18 + $0x50] sm:$0xff] }
  0x17   : > { %4722 = vmatpush3.msra.mxu0 %v5562_v8  ;;  %v713_v34 = vand.u32 4294901760, %v712_v23  ;;  %v5627_v36 = vand.u32 4294901760, %v393_v26  ;;  %v396_v37 = vsel %vm385_vm0, %v368_v27, 0  ;;  %v5633_v40 = vsub.f32 %v387_v24, %v5622_v33  ;;  %4755 = vmatprep.mubr.f32.mxu1 %v5622_v33  ;;  %v377_v27 = vld [vmem:[%s5600_s18 + $0x60] sm:$0xff] }
  0x18   : > { %4747 = vmatprep.subr.mxu1 %v692_v30  ;;  %v5636_v41 = vand.u32 4294901760, %v396_v37  ;;  %v399_v42 = vsel %vm385_vm0, %v369_v28, 0  ;;  %v402_v43 = vsel %vm385_vm0, %v370_v29, 0  ;;  %4779 = vmatprep.subr.mxu0 %v5566_v9  ;;  %v5642_v44 = vsub.f32 %v390_v25, %v5625_v35 }
  0x19   : > { %4748 = vmatpush3.msra.mxu1 %v692_v30  ;;  %v5645_v45 = vsub.f32 %v393_v26, %v5627_v36  ;;  %v5647_v46 = vand.u32 4294901760, %v399_v42  ;;  %v5649_v47 = vand.u32 4294901760, %v402_v43  ;;  %v505_v48 = vand.u32 4294901760, %v5633_v40  ;;  %v376_v26 = vld [vmem:[%s5600_s18 + $0x58] sm:$0xff] }
  0x1a   : > { %4749 = vmatprep.subr.mxu1 %v699_v31  ;;  %v5653_v49 = vsub.f32 %v396_v37, %v5636_v41  ;;  %v405_v50 = vsel %vm385_vm0, %v371_v38, 0  ;;  %v408_v51 = vsel %vm385_vm0, %v372_v39, 0  ;;  %v515_v52 = vand.u32 4294901760, %v5642_v44  ;;  %v378_v39 = vld [vmem:[%s5600_s18 + $0x68] sm:$0xff] }
  0x1b   : > { %4750 = vmatpush3.msra.mxu1 %v699_v31  ;;  %v525_v53 = vand.u32 4294901760, %v5645_v45  ;;  %v5660_v54 = vsub.f32 %v399_v42, %v5647_v46  ;;  %v5663_v55 = vsub.f32 %v402_v43, %v5649_v47  ;;  %v506_v56 = vsub.f32 %v5633_v40, %v505_v48 }
  0x1c   : > { %4751 = vmatprep.subr.mxu1 %v706_v32  ;;  %v535_v57 = vand.u32 4294901760, %v5653_v49  ;;  %v5669_v58 = vand.u32 4294901760, %v405_v50  ;;  %v5671_v59 = vand.u32 4294901760, %v408_v51  ;;  %v516_v60 = vsub.f32 %v5642_v44, %v515_v52 }
  0x1d   : > { %4752 = vmatpush3.msra.mxu1 %v706_v32  ;;  %v526_v61 = vsub.f32 %v5645_v45, %v525_v53  ;;  %v545_v62 = vand.u32 4294901760, %v5660_v54  ;;  %v555_v63 = vand.u32 4294901760, %v5663_v55  ;;  %v507_v1 = vand.u32 4294901760, %v506_v56 }
  0x1e   : > { %4753 = vmatprep.subr.mxu1 %v713_v34  ;;  %v536_v2 = vsub.f32 %v5653_v49, %v535_v57  ;;  %v5686_v3 = vsub.f32 %v405_v50, %v5669_v58  ;;  %v5689_v7 = vsub.f32 %v408_v51, %v5671_v59  ;;  %v517_v18 = vand.u32 4294901760, %v516_v60  ;;  %v379_v51 = vld [vmem:[%s5600_s18 + $0x70] sm:$0xff] }
  0x1f   : > { %4754 = vmatpush3.msra.mxu1 %v713_v34  ;;  %v527_v19 = vand.u32 4294901760, %v526_v61  ;;  %v546_v20 = vsub.f32 %v5660_v54, %v545_v62  ;;  %v556_v21 = vsub.f32 %v5663_v55, %v555_v63  ;;  %4723 = vmatprep.mubr.f32.mxu0 %v507_v1  ;;  %v411_v25 = vsel %vm385_vm0, %v373_v0, 0 }
  0x20   : > { %4756 = vmatmul.mubr.f32.vlgmr.msra.gmra.mxu1 %v5625_v35  ;;  %v565_v23 = vand.u32 4294901760, %v5686_v3  ;;  %v575_v24 = vand.u32 4294901760, %v5689_v7  ;;  %4724 = vmatmul.mubr.f32.vlgmr.msra.gmra.mxu0 %v517_v18  ;;  %v537_v28 = vand.u32 4294901760, %v536_v2  ;;  %v5706_v30 = vand.u32 4294901760, %v411_v25 }
  0x21   : > { %4811 = vmatprep.subr.mxu1 %v5553_v4  ;;  %v547_v29 = vand.u32 4294901760, %v546_v20  ;;  %v414_v31 = vsel %vm385_vm0, %v374_v17, 0  ;;  %4780 = vmatpush3.msra.mxu0 %v5566_v9  ;;  %v557_v32 = vand.u32 4294901760, %v556_v21  ;;  %v417_v38 = vsel %vm385_vm0, %v375_v22, 0 }
  0x22   : > { %4812 = vmatpush3.msra.mxu1 %v5553_v4  ;;  %v566_v34 = vsub.f32 %v5686_v3, %v565_v23  ;;  %v5714_v37 = vand.u32 4294901760, %v414_v31  ;;  %4726 = vmatprep.mubr.f32.mxu0 %v527_v19  ;;  %v5720_v42 = vsub.f32 %v411_v25, %v5706_v30  ;;  %v5722_v43 = vand.u32 4294901760, %v417_v38  ;;  %v380_v19 = vld [vmem:[%s5600_s18 + $0x78] sm:$0xff] }
  0x23   : > { %4758 = vmatprep.mubr.f32.mxu1 %v5627_v36  ;;  %v420_v9 = vsel %vm385_vm0, %v376_v26, 0  ;;  %v423_v50 = vsel %vm385_vm0, %v377_v27, 0  ;;  %4781 = vmatprep.subr.mxu0 %v5569_v10  ;;  %v576_v60 = vsub.f32 %v5689_v7, %v575_v24  ;;  %v426_v18 = vsel %vm385_vm0, %v378_v39, 0 }
  0x24   : > { %4759 = vmatmul.mubr.f32.gmra.mxu1 %v5636_v41  ;;  %v567_v56 = vand.u32 4294901760, %v566_v34  ;;  %v5733_v61 = vsub.f32 %v414_v31, %v5714_v37  ;;  %v5735_v0 = vand.u32 4294901760, %v420_v9  ;;  %4727 = vmatmul.mubr.f32.gmra.mxu0 %v537_v28  ;;  %v585_v1 = vand.u32 4294901760, %v5720_v42 }
  0x25   : > { %4761 = vmatprep.mubr.f32.mxu1 %v5647_v46  ;;  %v5740_v2 = vsub.f32 %v417_v38, %v5722_v43  ;;  %v5742_v17 = vand.u32 4294901760, %v423_v50  ;;  %4729 = vmatprep.mubr.f32.mxu0 %v547_v29  ;;  %v5751_v22 = vand.u32 4294901760, %v426_v18  ;;  %v429_v25 = vsel %vm385_vm0, %v379_v51, 0 }
  0x26   : > { %4782 = vmatpush3.msra.mxu0 %v5569_v10  ;;  %v595_v20 = vand.u32 4294901760, %v5733_v61  ;;  %v5749_v21 = vsub.f32 %v420_v9, %v5735_v0  ;;  %4813 = vmatprep.subr.mxu1 %v5555_v5  ;;  %v586_v26 = vsub.f32 %v5720_v42, %v585_v1  ;;  %v5763_v28 = vand.u32 4294901760, %v429_v25 }
  0x27   : > { %4783 = vmatprep.subr.mxu0 %v5572_v11  ;;  %v605_v27 = vand.u32 4294901760, %v5740_v2  ;;  %v5761_v10 = vsub.f32 %v423_v50, %v5742_v17  ;;  %v577_v29 = vand.u32 4294901760, %v576_v60  ;;  %v432_v31 = vsel %vm385_vm0, %v380_v19, 0  ;;  %4814 = vmatpush3.msra.mxu1 %v5555_v5 }
  0x28   : > { %4762 = vmatmul.mubr.f32.gmra.mxu1 %v5649_v47  ;;  %4784 = vmatpush3.msra.mxu0 %v5572_v11  ;;  %v587_v34 = vand.u32 4294901760, %v586_v26  ;;  %v596_v38 = vsub.f32 %v5733_v61, %v595_v20  ;;  %v615_v39 = vand.u32 4294901760, %v5749_v21  ;;  %v5774_v9 = vsub.f32 %v426_v18, %v5751_v22 }
  0x29   : > { %4730 = vmatmul.mubr.f32.gmra.mxu0 %v557_v32  ;;  %4764 = vmatprep.mubr.f32.mxu1 %v5669_v58  ;;  %v606_v11 = vsub.f32 %v5740_v2, %v605_v27  ;;  %v625_v32 = vand.u32 4294901760, %v5761_v10  ;;  %v5782_v50 = vsub.f32 %v429_v25, %v5763_v28  ;;  %v5784_v51 = vand.u32 4294901760, %v432_v31 }
  0x2a   : > { %4732 = vmatprep.mubr.f32.mxu0 %v567_v56  ;;  %4815 = vmatprep.subr.mxu1 %v5557_v6  ;;  %v597_v56 = vand.u32 4294901760, %v596_v38  ;;  %v616_v60 = vsub.f32 %v5749_v21, %v615_v39  ;;  %v635_v18 = vand.u32 4294901760, %v5774_v9 }
  0x2b   : > { %4785 = vmatprep.subr.mxu0 %v5578_v12  ;;  %v5796_v19 = vsub.f32 %v432_v31, %v5784_v51  ;;  %4816 = vmatpush3.msra.mxu1 %v5557_v6  ;;  %v607_v25 = vand.u32 4294901760, %v606_v11  ;;  %v645_v26 = vand.u32 4294901760, %v5782_v50 }
  0x2c   : > { %4765 = vmatmul.mubr.f32.gmra.mxu1 %v5671_v59  ;;  %4786 = vmatpush3.msra.mxu0 %v5578_v12  ;;  %v626_v12 = vsub.f32 %v5761_v10, %v625_v32  ;;  %v636_v31 = vsub.f32 %v5774_v9, %v635_v18 }
  0x2d   : > { %4733 = vmatmul.mubr.f32.gmra.mxu0 %v577_v29  ;;  %4767 = vmatprep.mubr.f32.mxu1 %v5706_v30  ;;  %v617_v29 = vand.u32 4294901760, %v616_v60  ;;  %v646_v11 = vsub.f32 %v5782_v50, %v645_v26 }
  0x2e   : > { %4735 = vmatprep.mubr.f32.mxu0 %v587_v34  ;;  %4817 = vmatprep.subr.mxu1 %v5562_v8  ;;  %v655_v34 = vand.u32 4294901760, %v5796_v19  ;;  %v627_v38 = vand.u32 4294901760, %v626_v12 }
  0x2f   : > { %4843 = vmatprep.subr.mxu0 %v5581_v13  ;;  %4818 = vmatpush3.msra.mxu1 %v5562_v8 }
  0x30   : > { %4768 = vmatmul.mubr.f32.gmra.mxu1 %v5714_v37  ;;  %4875 = vmatprep.subr.mxu1 %v5553_v4  ;;  %v656_v60 = vsub.f32 %v5796_v19, %v655_v34 }
  0x31   : > { %4736 = vmatmul.mubr.f32.gmra.mxu0 %v597_v56  ;;  %4770 = vmatprep.mubr.f32.mxu1 %v5722_v43  ;;  %v637_v56 = vand.u32 4294901760, %v636_v31  ;;  %v1658_v31 = vld [vmem:[%s7357_s3 + $0x20] sm:$0xff] }
  0x32   : > { %4738 = vmatprep.mubr.f32.mxu0 %v607_v25  ;;  %v647_v25 = vand.u32 4294901760, %v646_v11  ;;  %v657_v12 = vand.u32 4294901760, %v656_v60 }
  0x34   : > { %4771 = vmatmul.mubr.f32.gmra.mxu1 %v5735_v0 }
  0x35   : > { %4739 = vmatmul.mubr.f32.gmra.mxu0 %v617_v29  ;;  %4773 = vmatprep.mubr.f32.mxu1 %v5742_v17 }
  0x36   : > { %4741 = vmatprep.mubr.f32.mxu0 %v627_v38 }
  0x38   : > { %4774 = vmatmul.mubr.f32.gmra.mxu1 %v5751_v22 }
  0x39   : > { %4742 = vmatmul.mubr.f32.gmra.mxu0 %v637_v56  ;;  %4776 = vmatprep.mubr.f32.mxu1 %v5763_v28  ;;  %v6073_v56 = vand.u32 4294901760, %v1658_v31 }
  0x3a   : > { %4744 = vmatprep.mubr.f32.mxu0 %v647_v25  ;;  %v1657_v25 = vld [vmem:[%s7357_s3 + $0x18] sm:$0xff] }
  0x3b   : > { %7519 = vst [vmem:[#allocation35_spill] sm:$0xff] %v6073_v56 }
  0x3c   : > { %4777 = vmatmul.mubr.f32.gmra.mxu1 %v5784_v51 }
  0x3d   : > { %4745 = vmatmul.mubr.f32.gmra.mxu0 %v657_v12  ;;  %4819 = vmatprep.mubr.f32.mxu1 %v505_v48 }
  0x3e   : > { %4787 = vmatprep.mubr.f32.mxu0 %v5633_v40 }
  0x40   : > { %4820 = vmatmul.mubr.f32.vlgmr.msra.gmra.mxu1 %v515_v52 }
  0x41   : > { %4788 = vmatmul.mubr.f32.vlgmr.msra.gmra.mxu0 %v5642_v44  ;;  %4876 = vmatpush3.msra.mxu1 %v5553_v4  ;;  %v1669_v4 = vld [vmem:[%s7357_s3 + $0x78] sm:$0xff] }
  0x42   : > { %4844 = vmatpush3.msra.mxu0 %v5581_v13  ;;  %4790 = vmatprep.mubr.f32.mxu0 %v5645_v45  ;;  %v1665_v45 = vld [vmem:[%s7357_s3 + $0x58] sm:$0xff] }
  0x43   : > { %4822 = vmatprep.mubr.f32.mxu1 %v525_v53  ;;  %4845 = vmatprep.subr.mxu0 %v5585_v14  ;;  %v5973_v52 = vand.u32 4294901760, %v1665_v45  ;;  %v1664_v53 = vld [vmem:[%s7357_s3 + $0x50] sm:$0xff] }
  0x44   : > { %4823 = vmatmul.mubr.f32.gmra.mxu1 %v535_v57  ;;  %4846 = vmatpush3.msra.mxu0 %v5585_v14  ;;  %v1667_v14 = vld [vmem:[%s7357_s3 + $0x68] sm:$0xff] }
  0x45   : > { %4791 = vmatmul.mubr.f32.gmra.mxu0 %v5653_v49  ;;  %4825 = vmatprep.mubr.f32.mxu1 %v545_v62  ;;  %7499 = vst [vmem:[#allocation15_spill] sm:$0xff] %v5973_v52  ;;  %v1663_v62 = vld [vmem:[%s7357_s3 + $0x48] sm:$0xff] }
  0x46   : > { %4793 = vmatprep.mubr.f32.mxu0 %v5660_v54  ;;  %4877 = vmatprep.subr.mxu1 %v5555_v5 }
  0x47   : > { %4878 = vmatpush3.msra.mxu1 %v5555_v5  ;;  %4847 = vmatprep.subr.mxu0 %v5588_v15  ;;  %v5921_v5 = vand.u32 4294901760, %v1669_v4 }
  0x48   : > { %4826 = vmatmul.mubr.f32.gmra.mxu1 %v555_v63  ;;  %4848 = vmatpush3.msra.mxu0 %v5588_v15 }
  0x49   : > { %4794 = vmatmul.mubr.f32.gmra.mxu0 %v5663_v55  ;;  %4828 = vmatprep.mubr.f32.mxu1 %v565_v23  ;;  %7488 = vst [vmem:[#allocation4_spill] sm:$0xff] %v5921_v5  ;;  %v5998_v23 = vand.u32 4294901760, %v1663_v62 }
  0x4a   : > { %4796 = vmatprep.mubr.f32.mxu0 %v5686_v3  ;;  %4879 = vmatprep.subr.mxu1 %v5557_v6 }
  0x4b   : > { %4880 = vmatpush3.msra.mxu1 %v5557_v6  ;;  %4849 = vmatprep.subr.mxu0 %v5593_v16  ;;  %v1668_v6 = vld [vmem:[%s7357_s3 + $0x70] sm:$0xff]  ;;  %7504 = vst [vmem:[#allocation20_spill] sm:$0xff] %v5998_v23 }
  0x4c   : > { %4829 = vmatmul.mubr.f32.gmra.mxu1 %v575_v24  ;;  %4850 = vmatpush3.msra.mxu0 %v5593_v16  ;;  %v5929_v13 = vand.u32 4294901760, %v1668_v6 }
  0x4d   : > { %4797 = vmatmul.mubr.f32.gmra.mxu0 %v5689_v7  ;;  %4831 = vmatprep.mubr.f32.mxu1 %v585_v1  ;;  %v1661_v1 = vld [vmem:[%s7357_s3 + $0x38] sm:$0xff] }
  0x4e   : > { %4799 = vmatprep.mubr.f32.mxu0 %v5720_v42  ;;  %4881 = vmatprep.subr.mxu1 %v5562_v8  ;;  %7490 = vst [vmem:[#allocation6_spill] sm:$0xff] %v5929_v13  ;;  %v5940_v16 = vsub.f32 %v1668_v6, %v5929_v13  ;;  %v6087_v6 = vsub.f32 %v1658_v31, %v6073_v56 }
  0x4f   : > { %4882 = vmatpush3.msra.mxu1 %v5562_v8  ;;  %v5927_v8 = vsub.f32 %v1669_v4, %v5921_v5  ;;  %4907 = vmatprep.subr.mxu0 %v5921_v5 }
  0x50   : > { %4832 = vmatmul.mubr.f32.gmra.mxu1 %v595_v20  ;;  %7492 = vst [vmem:[#allocation8_spill] sm:$0xff] %v5940_v16  ;;  %v5952_v40 = vand.u32 4294901760, %v5940_v16  ;;  %7522 = vst [vmem:[#allocation38_spill] sm:$0xff] %v6087_v6 }
  0x51   : > { %4800 = vmatmul.mubr.f32.gmra.mxu0 %v5733_v61  ;;  %4834 = vmatprep.mubr.f32.mxu1 %v605_v27  ;;  %7489 = vst [vmem:[#allocation5_spill] sm:$0xff] %v5927_v8  ;;  %v5937_v15 = vand.u32 4294901760, %v5927_v8  ;;  %v1660_v27 = vld [vmem:[%s7357_s3 + $0x30] sm:$0xff] }
  0x52   : > { %4802 = vmatprep.mubr.f32.mxu0 %v5740_v2  ;;  %7494 = vst [vmem:[#allocation10_spill] sm:$0xff] %v5952_v40 }
  0x53   : > { %7491 = vst [vmem:[#allocation7_spill] sm:$0xff] %v5937_v15 }
  0x54   : > { %4835 = vmatmul.mubr.f32.gmra.mxu1 %v615_v39 }
  0x55   : > { %4803 = vmatmul.mubr.f32.gmra.mxu0 %v5749_v21  ;;  %4837 = vmatprep.mubr.f32.mxu1 %v625_v32  ;;  %v6031_v21 = vand.u32 4294901760, %v1661_v1  ;;  %v6047_v32 = vand.u32 4294901760, %v1660_v27 }
  0x56   : > { %4805 = vmatprep.mubr.f32.mxu0 %v5761_v10 }
  0x57   : > { %7511 = vst [vmem:[#allocation27_spill] sm:$0xff] %v6031_v21  ;;  %7514 = vst [vmem:[#allocation30_spill] sm:$0xff] %v6047_v32  ;;  %v6062_v29 = vsub.f32 %v1660_v27, %v6047_v32 }
  0x58   : > { %4838 = vmatmul.mubr.f32.gmra.mxu1 %v635_v18 }
  0x59   : > { %4806 = vmatmul.mubr.f32.gmra.mxu0 %v5774_v9  ;;  %4840 = vmatprep.mubr.f32.mxu1 %v645_v26  ;;  %v6044_v9 = vsub.f32 %v1661_v1, %v6031_v21  ;;  %7517 = vst [vmem:[#allocation33_spill] sm:$0xff] %v6062_v29  ;;  %v6077_v60 = vand.u32 4294901760, %v6062_v29 }
  0x5a   : > { %4808 = vmatprep.mubr.f32.mxu0 %v5782_v50  ;;  %v1659_v50 = vld [vmem:[%s7357_s3 + $0x28] sm:$0xff] }
  0x5b   : > { %7513 = vst [vmem:[#allocation29_spill] sm:$0xff] %v6044_v9  ;;  %v6058_v26 = vand.u32 4294901760, %v1659_v50  ;;  %7520 = vst [vmem:[#allocation36_spill] sm:$0xff] %v6077_v60 }
  0x5c   : > { %4841 = vmatmul.mubr.f32.gmra.mxu1 %v655_v34 }
  0x5d   : > { %4809 = vmatmul.mubr.f32.gmra.mxu0 %v5796_v19  ;;  %4883 = vmatprep.mubr.f32.mxu1 %v5622_v33  ;;  %v6056_v19 = vand.u32 4294901760, %v6044_v9  ;;  %7516 = vst [vmem:[#allocation32_spill] sm:$0xff] %v6058_v26  ;;  %v6071_v11 = vsub.f32 %v1659_v50, %v6058_v26 }
  0x5e   : > { %4851 = vmatprep.mubr.f32.mxu0 %v5622_v33  ;;  %v5942_v33 = vand.u32 4294901760, %v1667_v14 }
  0x5f   : > { %7515 = vst [vmem:[#allocation31_spill] sm:$0xff] %v6056_v19  ;;  %v1978_v38 = vsub.f32 %v6044_v9, %v6056_v19  ;;  %7518 = vst [vmem:[#allocation34_spill] sm:$0xff] %v6071_v11  ;;  %v6084_v4 = vand.u32 4294901760, %v6071_v11 }
  0x60   : > { %4884 = vmatmul.mubr.f32.vlgmr.msra.gmra.mxu1 %v5625_v35  ;;  %7493 = vst [vmem:[#allocation9_spill] sm:$0xff] %v5942_v33 }
  0x61   : > { %4852 = vmatmul.mubr.f32.vlgmr.msra.gmra.mxu0 %v5625_v35  ;;  %4886 = vmatprep.mubr.f32.mxu1 %v5627_v36  ;;  %v1666_v35 = vld [vmem:[%s7357_s3 + $0x60] sm:$0xff]  ;;  %v1979_v12 = vand.u32 4294901760, %v1978_v38  ;;  %7521 = vst [vmem:[#allocation37_spill] sm:$0xff] %v6084_v4 }
  0x62   : > { %4854 = vmatprep.mubr.f32.mxu0 %v5627_v36  ;;  %4908 = vmatpush3.msra.mxu0 %v5921_v5  ;;  %v1922_v36 = vsub.f32 %v5927_v8, %v5937_v15  ;;  %v5957_v44 = vand.u32 4294901760, %v1666_v35 }
  0x63   : > { %4909 = vmatprep.subr.mxu0 %v5929_v13 }
  0x64   : > { %4887 = vmatmul.mubr.f32.gmra.mxu1 %v5636_v41  ;;  %4910 = vmatpush3.msra.mxu0 %v5929_v13  ;;  %7496 = vst [vmem:[#allocation12_spill] sm:$0xff] %v5957_v44  ;;  %v5970_v49 = vsub.f32 %v1666_v35, %v5957_v44  ;;  %v1985_v35 = vsub.f32 %v6062_v29, %v6077_v60 }
  0x65   : > { %4855 = vmatmul.mubr.f32.gmra.mxu0 %v5636_v41  ;;  %4889 = vmatprep.mubr.f32.mxu1 %v5647_v46  ;;  %v5955_v41 = vsub.f32 %v1667_v14, %v5942_v33  ;;  %v6089_v14 = vand.u32 4294901760, %v1657_v25 }
  0x66   : > { %4857 = vmatprep.mubr.f32.mxu0 %v5647_v46  ;;  %4911 = vmatprep.subr.mxu0 %v5942_v33  ;;  %v1923_v46 = vand.u32 4294901760, %v1922_v36  ;;  %7498 = vst [vmem:[#allocation14_spill] sm:$0xff] %v5970_v49  ;;  %v5982_v57 = vand.u32 4294901760, %v5970_v49  ;;  %v1992_v36 = vsub.f32 %v6071_v11, %v6084_v4 }
  0x67   : > { %7495 = vst [vmem:[#allocation11_spill] sm:$0xff] %v5955_v41  ;;  %4912 = vmatpush3.msra.mxu0 %v5942_v33  ;;  %v5967_v48 = vand.u32 4294901760, %v5955_v41  ;;  %7523 = vst [vmem:[#allocation39_spill] sm:$0xff] %v6089_v14 }
  0x68   : > { %4890 = vmatmul.mubr.f32.gmra.mxu1 %v5649_v47  ;;  %4913 = vmatprep.subr.mxu0 %v5957_v44  ;;  %7500 = vst [vmem:[#allocation16_spill] sm:$0xff] %v5982_v57  ;;  %v1943_v3 = vsub.f32 %v5970_v49, %v5982_v57 }
  0x69   : > { %4858 = vmatmul.mubr.f32.gmra.mxu0 %v5649_v47  ;;  %4892 = vmatprep.mubr.f32.mxu1 %v5669_v58  ;;  %v1929_v47 = vsub.f32 %v5940_v16, %v5952_v40  ;;  %7497 = vst [vmem:[#allocation13_spill] sm:$0xff] %v5967_v48  ;;  %v1936_v55 = vsub.f32 %v5955_v41, %v5967_v48 }
  0x6a   : > { %4860 = vmatprep.mubr.f32.mxu0 %v5669_v58  ;;  %4914 = vmatpush3.msra.mxu0 %v5957_v44  ;;  %v5984_v58 = vand.u32 4294901760, %v1664_v53 }
  0x6b   : > { %4963 = vmatprep.subr.mxu1 %v1923_v46  ;;  %v1930_v54 = vand.u32 4294901760, %v1929_v47  ;;  %4915 = vmatprep.subr.mxu0 %v5973_v52  ;;  %v1937_v63 = vand.u32 4294901760, %v1936_v55  ;;  %v1656_v47 = vld [vmem:[%s7357_s3 + $0x10] sm:$0xff]  ;;  %v1993_v55 = vand.u32 4294901760, %v1992_v36 }
  0x6c   : > { %4893 = vmatmul.mubr.f32.gmra.mxu1 %v5671_v59  ;;  %7501 = vst [vmem:[#allocation17_spill] sm:$0xff] %v5984_v58  ;;  %v5996_v7 = vsub.f32 %v1664_v53, %v5984_v58  ;;  %4916 = vmatpush3.msra.mxu0 %v5973_v52  ;;  %v1986_v53 = vand.u32 4294901760, %v1985_v35 }
  0x6d   : > { %4861 = vmatmul.mubr.f32.gmra.mxu0 %v5671_v59  ;;  %4895 = vmatprep.mubr.f32.mxu1 %v5706_v30  ;;  %v5987_v59 = vsub.f32 %v1665_v45, %v5973_v52  ;;  %v6098_v45 = vand.u32 4294901760, %v6087_v6 }
  0x6e   : > { %4863 = vmatprep.mubr.f32.mxu0 %v5706_v30  ;;  %4964 = vmatpush3.msra.mxu1 %v1923_v46  ;;  %7503 = vst [vmem:[#allocation19_spill] sm:$0xff] %v5996_v7  ;;  %v1662_v30 = vld [vmem:[%s7357_s3 + $0x40] sm:$0xff]  ;;  %v6009_v42 = vand.u32 4294901760, %v5996_v7  ;;  %v6101_v46 = vsub.f32 %v1657_v25, %v6089_v14 }
  0x6f   : > { %7502 = vst [vmem:[#allocation18_spill] sm:$0xff] %v5987_v59  ;;  %4965 = vmatprep.subr.mxu1 %v1930_v54  ;;  %v6002_v24 = vand.u32 4294901760, %v5987_v59  ;;  %4917 = vmatprep.subr.mxu0 %v5984_v58  ;;  %v6014_v61 = vand.u32 4294901760, %v1662_v30  ;;  %7524 = vst [vmem:[#allocation40_spill] sm:$0xff] %v6098_v45 }
  0x70   : > { %4896 = vmatmul.mubr.f32.gmra.mxu1 %v5714_v37  ;;  %7506 = vst [vmem:[#allocation22_spill] sm:$0xff] %v6009_v42  ;;  %4918 = vmatpush3.msra.mxu0 %v5984_v58  ;;  %v1957_v2 = vsub.f32 %v5996_v7, %v6009_v42  ;;  %7525 = vst [vmem:[#allocation41_spill] sm:$0xff] %v6101_v46 }
  0x71   : > { %4864 = vmatmul.mubr.f32.gmra.mxu0 %v5714_v37  ;;  %4898 = vmatprep.mubr.f32.mxu1 %v5722_v43  ;;  %7505 = vst [vmem:[#allocation21_spill] sm:$0xff] %v6002_v24  ;;  %v1944_v37 = vand.u32 4294901760, %v1943_v3  ;;  %7508 = vst [vmem:[#allocation24_spill] sm:$0xff] %v6014_v61  ;;  %v6029_v20 = vsub.f32 %v1662_v30, %v6014_v61  ;;  %v1655_v3 = vld [vmem:[%s7357_s3 + $0x8] sm:$0xff] }
  0x72   : > { %4866 = vmatprep.mubr.f32.mxu0 %v5722_v43  ;;  %4966 = vmatpush3.msra.mxu1 %v1930_v54  ;;  %v6012_v43 = vsub.f32 %v1663_v62, %v5998_v23  ;;  %v1958_v10 = vand.u32 4294901760, %v1957_v2  ;;  %v6107_v54 = vand.u32 4294901760, %v1656_v47  ;;  %v1999_v62 = vsub.f32 %v6087_v6, %v6098_v45  ;;  %v1654_v2 = vld [vmem:[%s7357_s3] sm:$0xff] }
  0x73   : > { %4967 = vmatprep.subr.mxu1 %v1937_v63  ;;  %4919 = vmatprep.subr.mxu0 %v5998_v23  ;;  %7510 = vst [vmem:[#allocation26_spill] sm:$0xff] %v6029_v20  ;;  %v6041_v39 = vand.u32 4294901760, %v6029_v20 }
  0x74   : > { %4899 = vmatmul.mubr.f32.gmra.mxu1 %v5735_v0  ;;  %7507 = vst [vmem:[#allocation23_spill] sm:$0xff] %v6012_v43  ;;  %4920 = vmatpush3.msra.mxu0 %v5998_v23  ;;  %7526 = vst [vmem:[#allocation42_spill] sm:$0xff] %v6107_v54  ;;  %v6120_v30 = vsub.f32 %v1656_v47, %v6107_v54 }
  0x75   : > { %4867 = vmatmul.mubr.f32.gmra.mxu0 %v5735_v0  ;;  %4901 = vmatprep.mubr.f32.mxu1 %v5742_v17  ;;  %v1950_v0 = vsub.f32 %v5987_v59, %v6002_v24  ;;  %7512 = vst [vmem:[#allocation28_spill] sm:$0xff] %v6041_v39  ;;  %v1971_v18 = vsub.f32 %v6029_v20, %v6041_v39 }
  0x76   : > { %4869 = vmatprep.mubr.f32.mxu0 %v5742_v17  ;;  %4968 = vmatpush3.msra.mxu1 %v1937_v63  ;;  %v6026_v17 = vand.u32 4294901760, %v6012_v43  ;;  %v6113_v63 = vand.u32 4294901760, %v6101_v46  ;;  %7528 = vst [vmem:[#allocation44_spill] sm:$0xff] %v6120_v30 }
  0x77   : > { %4969 = vmatprep.subr.mxu1 %v1944_v37  ;;  %4921 = vmatprep.subr.mxu0 %v6014_v61  ;;  %v1972_v34 = vand.u32 4294901760, %v1971_v18 }
  0x78   : > { %4902 = vmatmul.mubr.f32.gmra.mxu1 %v5751_v22  ;;  %7509 = vst [vmem:[#allocation25_spill] sm:$0xff] %v6026_v17  ;;  %4922 = vmatpush3.msra.mxu0 %v6014_v61  ;;  %7527 = vst [vmem:[#allocation43_spill] sm:$0xff] %v6113_v63  ;;  %v2006_v1 = vsub.f32 %v6101_v46, %v6113_v63 }
  0x79   : > { %4870 = vmatmul.mubr.f32.gmra.mxu0 %v5751_v22  ;;  %4904 = vmatprep.mubr.f32.mxu1 %v5763_v28  ;;  %v1951_v22 = vand.u32 4294901760, %v1950_v0  ;;  %v2000_v0 = vand.u32 4294901760, %v1999_v62 }
  0x7a   : > { %4872 = vmatprep.mubr.f32.mxu0 %v5763_v28  ;;  %4970 = vmatpush3.msra.mxu1 %v1944_v37  ;;  %v1964_v28 = vsub.f32 %v6012_v43, %v6026_v17  ;;  %v6122_v37 = vand.u32 4294901760, %v1655_v3 }
  0x7b   : > { %4971 = vmatprep.subr.mxu1 %v1951_v22  ;;  %4923 = vmatprep.subr.mxu0 %v6031_v21 }
  0x7c   : > { %4905 = vmatmul.mubr.f32.gmra.mxu1 %v5784_v51  ;;  %4924 = vmatpush3.msra.mxu0 %v6031_v21  ;;  %7529 = vst [vmem:[#allocation45_spill] sm:$0xff] %v6122_v37  ;;  %v6135_v27 = vsub.f32 %v1655_v3, %v6122_v37 }
  0x7d   : > { %4873 = vmatmul.mubr.f32.gmra.mxu0 %v5784_v51  ;;  %4972 = vmatpush3.msra.mxu1 %v1951_v22  ;;  %v1965_v51 = vand.u32 4294901760, %v1964_v28  ;;  %v6132_v22 = vand.u32 4294901760, %v6120_v30  ;;  %v2007_v28 = vand.u32 4294901760, %v2006_v1 }
  0x7e   : > { %4973 = vmatprep.subr.mxu1 %v1958_v10  ;;  %4925 = vmatprep.subr.mxu0 %v6047_v32  ;;  %7531 = vst [vmem:[#allocation47_spill] sm:$0xff] %v6135_v27 }
  0x7f   : > { %4974 = vmatpush3.msra.mxu1 %v1958_v10  ;;  %4926 = vmatpush3.msra.mxu0 %v6047_v32  ;;  %7530 = vst [vmem:[#allocation46_spill] sm:$0xff] %v6132_v22  ;;  %v6137_v10 = vand.u32 4294901760, %v1654_v2  ;;  %v2013_v50 = vsub.f32 %v6120_v30, %v6132_v22 }
  0x80   : > { %4975 = vmatprep.subr.mxu1 %v1965_v51  ;;  %4927 = vmatprep.subr.mxu0 %v6058_v26 }
  0x81   : > { %4976 = vmatpush3.msra.mxu1 %v1965_v51  ;;  %4928 = vmatpush3.msra.mxu0 %v6058_v26  ;;  %7532 = vst [vmem:[#allocation48_spill] sm:$0xff] %v6137_v10  ;;  %v6144_v51 = vand.u32 4294901760, %v6135_v27  ;;  %v6147_v18 = vsub.f32 %v1654_v2, %v6137_v10  ;;  %v2014_v31 = vand.u32 4294901760, %v2013_v50 }
  0x82   : > { %4977 = vmatprep.subr.mxu1 %v1972_v34  ;;  %4929 = vmatprep.subr.mxu0 %v6073_v56 }
  0x83   : > { %4978 = vmatpush3.msra.mxu1 %v1972_v34  ;;  %4930 = vmatpush3.msra.mxu0 %v6073_v56  ;;  %7533 = vst [vmem:[#allocation49_spill] sm:$0xff] %v6144_v51  ;;  %7534 = vst [vmem:[#allocation50_spill] sm:$0xff] %v6147_v18  ;;  %v2020_v34 = vsub.f32 %v6135_v27, %v6144_v51  ;;  %v6154_v38 = vand.u32 4294901760, %v6147_v18 }
  0x84   : > { %4979 = vmatprep.subr.mxu1 %v1979_v12  ;;  %4931 = vmatprep.subr.mxu0 %v6089_v14 }
  0x85   : > { %4980 = vmatpush3.msra.mxu1 %v1979_v12  ;;  %4932 = vmatpush3.msra.mxu0 %v6089_v14  ;;  %7535 = vst [vmem:[#allocation51_spill] sm:$0xff] %v6154_v38  ;;  %v2021_v25 = vand.u32 4294901760, %v2020_v34  ;;  %v2027_v12 = vsub.f32 %v6147_v18, %v6154_v38 }
  0x86   : > { %4981 = vmatprep.subr.mxu1 %v1986_v53  ;;  %4933 = vmatprep.subr.mxu0 %v6107_v54 }
  0x87   : > { %4982 = vmatpush3.msra.mxu1 %v1986_v53  ;;  %4934 = vmatpush3.msra.mxu0 %v6107_v54  ;;  %v2028_v35 = vand.u32 4294901760, %v2027_v12 }
  0x88   : > { %4983 = vmatprep.subr.mxu1 %v1993_v55  ;;  %4935 = vmatprep.subr.mxu0 %v6122_v37 }
  0x89   : > { %4984 = vmatpush3.msra.mxu1 %v1993_v55  ;;  %4936 = vmatpush3.msra.mxu0 %v6122_v37 }
  0x8a   : > { %4985 = vmatprep.subr.mxu1 %v2000_v0  ;;  %4937 = vmatprep.subr.mxu0 %v6137_v10 }
  0x8b   : > { %4986 = vmatpush3.msra.mxu1 %v2000_v0  ;;  %4938 = vmatpush3.msra.mxu0 %v6137_v10 }
  0x8c   : > { %4987 = vmatprep.subr.mxu1 %v2007_v28  ;;  %5019 = vmatprep.subr.mxu0 %v5927_v8 }
  0x8d   : > { %4988 = vmatpush3.msra.mxu1 %v2007_v28 }
  0x8e   : > { %4989 = vmatprep.subr.mxu1 %v2014_v31 }
  0x8f   : > { %4990 = vmatpush3.msra.mxu1 %v2014_v31 }
  0x90   : > { %4991 = vmatprep.subr.mxu1 %v2021_v25 }
  0x91   : > { %4992 = vmatpush3.msra.mxu1 %v2021_v25 }
  0x92   : > { %4993 = vmatprep.subr.mxu1 %v2028_v35 }
  0x93   : > { %4994 = vmatpush3.msra.mxu1 %v2028_v35 }
  0x94   : > { %5075 = vmatprep.subr.mxu1 %v5921_v5 }
  0xe0   : > { %v4757_v36 = vpop.f32.mrf.mxu1  ;;  %v4725_v47 = vpop.f32.mrf.mxu0 }
  0xe1   : > { %v757_v23 = vadd.f32 %v4757_v36, %v4725_v47 }
  0xe2   : > { %v6160_v53 = vpop.f32.mrf.mxu1  ;;  %v509_v55 = vpop.f32.mrf.mxu0 }
  0xe3   : > { %v751_v16 = vadd.f32 %v6160_v53, %v509_v55 }
  0xe4   : > { %v6162_v62 = vpop.f32.mrf.mxu1  ;;  %v6164_v3 = vpop.f32.mrf.mxu0 }
  0xe5   : > { %v769_v33 = vadd.f32 %v6162_v62, %v6164_v3 }
  0xe6   : > { %v6166_v0 = vpop.f32.mrf.mxu1  ;;  %v6168_v1 = vpop.f32.mrf.mxu0 }
  0xe8   : > { %v6170_v2 = vpop.f32.mrf.mxu1 }
  0xe9   : > { %v6172_v28 = vpop.f32.mrf.mxu0 }
  0xea   : > { %v6174_v50 = vpop.f32.mrf.mxu1  ;;  %v781_v36 = vadd.f32 %v6170_v2, %v6172_v28 }
  0xeb   : > { %v6176_v31 = vpop.f32.mrf.mxu0 }
  0xec   : > { %v6178_v34 = vpop.f32.mrf.mxu1 }
  0xed   : > { %v6180_v25 = vpop.f32.mrf.mxu0 }
  0xee   : > { %v6182_v12 = vpop.f32.mrf.mxu1  ;;  %v793_v62 = vadd.f32 %v6178_v34, %v6180_v25 }
  0xef   : > { %v6184_v35 = vpop.f32.mrf.mxu0 }
  0xf0   : > { %v4769_v38 = vpop.f32.mrf.mxu1 }
  0xf1   : > { %v4737_v51 = vpop.f32.mrf.mxu0 }
  0xf2   : > { %v6186_v22 = vadd.f32 %v4769_v38, %v4737_v51  ;;  %v6188_v63 = vpop.f32.mrf.mxu1 }
  0xf3   : > { %v6190_v45 = vpop.f32.mrf.mxu0 }
  0xf4   : > { %v4772_v4 = vpop.f32.mrf.mxu1 }
  0xf5   : > { %v4740_v60 = vpop.f32.mrf.mxu0 }
  0xf6   : > { %v6192_v19 = vadd.f32 %v4772_v4, %v4740_v60  ;;  %v6194_v39 = vpop.f32.mrf.mxu1 }
  0xf7   : > { %v6196_v17 = vpop.f32.mrf.mxu0 }
  0xf8   : > { %v4775_v42 = vpop.f32.mrf.mxu1 }
  0xf9   : > { %v4743_v24 = vpop.f32.mrf.mxu0 }
  0xfa   : > { %v6198_v57 = vadd.f32 %v4775_v42, %v4743_v24  ;;  %v822_v48 = vpop.f32.mrf.mxu1 }
  0xfb   : > { %v629_v40 = vpop.f32.mrf.mxu0 }
  0xfc   : > { %v4778_v51 = vpop.f32.mrf.mxu1 }
  0xfd   : > { %v4746_v38 = vpop.f32.mrf.mxu0 }
  0xfe   : > { %v6200_v15 = vadd.f32 %v4778_v51, %v4746_v38  ;;  %v834_v18 = vpop.f32.mrf.mxu1 }
  0xff   : > { %v649_v27 = vpop.f32.mrf.mxu0 }
 0x100   : > { %7536 = vst [vmem:[#allocation52_spill] sm:$0xff] %v6200_v15  ;;  %v4821_v30 = vpop.f32.mrf.mxu1  ;;  %v763_v15 = vadd.f32 %v6166_v0, %v6168_v1  ;;  %v787_v0 = vadd.f32 %v6182_v12, %v6184_v35 }
 0x101   : > { %v4789_v46 = vpop.f32.mrf.mxu0 }
 0x102   : > { %v1102_v60 = vpop.f32.mrf.mxu1  ;;  %v928_v52 = vadd.f32 %v4789_v46, %v757_v23  ;;  %v775_v23 = vadd.f32 %v6174_v50, %v6176_v31 }
 0x103   : > { %v920_v4 = vpop.f32.mrf.mxu0 }
 0x104   : > { %v4824_v10 = vpop.f32.mrf.mxu1  ;;  %v921_v13 = vadd.f32 %v920_v4, %v751_v16  ;;  %v1111_v46 = vadd.f32 %v4821_v30, %v928_v52  ;;  %v823_v52 = vadd.f32 %v822_v48, %v629_v40 }
 0x105   : > { %v4792_v6 = vpop.f32.mrf.mxu0 }
 0x106   : > { %v1118_v37 = vpop.f32.mrf.mxu1  ;;  %v942_v53 = vadd.f32 %v4792_v6, %v769_v33  ;;  %v1103_v1 = vadd.f32 %v1102_v60, %v921_v13  ;;  %v811_v33 = vadd.f32 %v6194_v39, %v6196_v17 }
 0x107   : > { %v934_v11 = vpop.f32.mrf.mxu0 }
 0x108   : > { %v4827_v54 = vpop.f32.mrf.mxu1  ;;  %v935_v16 = vadd.f32 %v934_v11, %v763_v15  ;;  %v6244_v15 = vld [vmem:[%s7356_s2] ss:$0 sm:$0xff]  ;;  %v6246_v11 = vadd.f32 %v834_v18, %v649_v27  ;;  %v1127_v13 = vadd.f32 %v4824_v10, %v942_v53 }
 0x109   : > { %v4795_v29 = vpop.f32.mrf.mxu0 }
 0x10a   : > { %v1134_v24 = vpop.f32.mrf.mxu1  ;;  %v956_v3 = vadd.f32 %v4795_v29, %v781_v36  ;;  %v1119_v34 = vadd.f32 %v1118_v37, %v935_v16 }
 0x10b   : > { %v948_v42 = vpop.f32.mrf.mxu0 }
 0x10c   : > { %v4830_v14 = vpop.f32.mrf.mxu1  ;;  %v1143_v25 = vadd.f32 %v4827_v54, %v956_v3 }
 0x10d   : > { %v4798_v9 = vpop.f32.mrf.mxu0 }
 0x10e   : > { %v6202_v56 = vpop.f32.mrf.mxu1  ;;  %v970_v6 = vadd.f32 %v4798_v9, %v793_v62 }
 0x10f   : > { %v962_v51 = vpop.f32.mrf.mxu0 }
 0x110   : > { %v6204_v38 = vpop.f32.mrf.mxu1  ;;  %v1159_v35 = vadd.f32 %v4830_v14, %v970_v6 }
 0x111   : > { %v4801_v20 = vpop.f32.mrf.mxu0 }
 0x112   : > { %v6206_v26 = vpop.f32.mrf.mxu1 }
 0x113   : > { %v976_v43 = vpop.f32.mrf.mxu0 }
 0x114   : > { %v6208_v32 = vpop.f32.mrf.mxu1 }
 0x115   : > { %v4804_v7 = vpop.f32.mrf.mxu0 }
 0x116   : > { %v6210_v21 = vpop.f32.mrf.mxu1  ;;  %v998_v27 = vadd.f32 %v4804_v7, %v6192_v19 }
 0x117   : > { %v990_v59 = vpop.f32.mrf.mxu0 }
 0x118   : > { %v6212_v61 = vpop.f32.mrf.mxu1  ;;  %v991_v10 = vadd.f32 %v990_v59, %v811_v33  ;;  %v7539_v33 = vld [vmem:[#allocation52_spill] sm:$0xff] }
 0x119   : > { %v4807_v49 = vpop.f32.mrf.mxu0 }
 0x11a   : > { %v6214_v41 = vpop.f32.mrf.mxu1 }
 0x11b   : > { %v1004_v58 = vpop.f32.mrf.mxu0 }
 0x11c   : > { %v6217_v8 = vpop.f32.mrf.mxu1 }
 0x11d   : > { %v6219_v44 = vpop.f32.mrf.mxu0 }
 0x11e   : > { %v6223_v5 = vpop.f32.mrf.mxu1 }
 0x11f   : > { %7537 = vst [vmem:[#allocation53_spill] sm:$0xff] %v6223_v5  ;;  %v6229_v47 = vpop.f32.mrf.mxu0  ;;  %v949_v5 = vadd.f32 %v948_v42, %v775_v23 }
 0x120   : > { %7538 = vst [vmem:[#allocation54_spill] sm:$0xff] %v6229_v47  ;;  %v4885_v55 = vpop.f32.mrf.mxu1  ;;  %v799_v47 = vadd.f32 %v6188_v63, %v6190_v45  ;;  %v963_v45 = vadd.f32 %v962_v51, %v787_v0  ;;  %v984_v63 = vadd.f32 %v4801_v20, %v6186_v22  ;;  %v1012_v22 = vadd.f32 %v4807_v49, %v6198_v57 }
 0x121   : > { %v4853_v4 = vpop.f32.mrf.mxu0  ;;  %v1135_v40 = vadd.f32 %v1134_v24, %v949_v5  ;;  %v1005_v24 = vadd.f32 %v1004_v58, %v823_v52 }
 0x122   : > { %v1312_v2 = vadd.f32 %v4853_v4, %v1111_v46  ;;  %v1470_v28 = vpop.f32.mrf.mxu1  ;;  %v977_v60 = vadd.f32 %v976_v43, %v799_v47  ;;  %v1151_v20 = vadd.f32 %v6202_v56, %v963_v45  ;;  %v1175_v5 = vadd.f32 %v6204_v38, %v984_v63 }
 0x123   : > { %v1305_v29 = vpop.f32.mrf.mxu0  ;;  %v6260_v46 = vadd.f32 %v6208_v32, %v998_v27  ;;  %v6263_v56 = vadd.f32 %v6210_v21, %v991_v10  ;;  %v6272_v16 = vadd.f32 %v6212_v61, %v1012_v22  ;;  %v6275_v32 = vadd.f32 %v6214_v41, %v1005_v24 }
 0x124   : > { %v1477_v30 = vadd.f32 %v4885_v55, %v1312_v2  ;;  %v1306_v50 = vadd.f32 %v1305_v29, %v1103_v1  ;;  %v4888_v31 = vpop.f32.mrf.mxu1  ;;  %v1167_v47 = vadd.f32 %v6206_v26, %v977_v60  ;;  %v1026_v61 = vadd.f32 %v6219_v44, %v7539_v33 }
 0x125   : > { %v4856_v17 = vpop.f32.mrf.mxu0 }
 0x126   : > { %v1623_v48 = vadd.f32 %v6244_v15, %v1477_v30  ;;  %v1471_v39 = vadd.f32 %v1470_v28, %v1306_v50  ;;  %v1324_v9 = vadd.f32 %v4856_v17, %v1127_v13  ;;  %v1482_v12 = vpop.f32.mrf.mxu1 }
 0x127   : > { %v1317_v18 = vpop.f32.mrf.mxu0 }
 0x128   : > { %v1639_v42 = vmax.f32 %v1623_v48, 0.0  ;;  %v1622_v37 = vadd.f32 %v6244_v15, %v1471_v39  ;;  %v1489_v54 = vadd.f32 %v4888_v31, %v1324_v9  ;;  %v1318_v51 = vadd.f32 %v1317_v18, %v1119_v34  ;;  %v4891_v36 = vpop.f32.mrf.mxu1  ;;  %v7540_v34 = vld [vmem:[#allocation4_spill] sm:$0xff] }
 0x129   : > { %v4859_v23 = vpop.f32.mrf.mxu0 }
 0x12a   : > { %v6255_v14 = vand.u32 4294901760, %v1639_v42  ;;  %v1638_v43 = vmax.f32 %v1622_v37, 0.0  ;;  %v1625_v59 = vadd.f32 %v6244_v15, %v1489_v54  ;;  %v1483_v7 = vadd.f32 %v1482_v12, %v1318_v51  ;;  %v1494_v19 = vpop.f32.mrf.mxu1 }
 0x12b   : > { %v1336_v38 = vadd.f32 %v4859_v23, %v1143_v25  ;;  %v1329_v53 = vpop.f32.mrf.mxu0 }
 0x12c   : > { %v6266_v49 = vsub.f32 %v1639_v42, %v6255_v14  ;;  %v6268_v57 = vand.u32 4294901760, %v1638_v43  ;;  %v1641_v58 = vmax.f32 %v1625_v59, 0.0  ;;  %v1624_v55 = vadd.f32 %v6244_v15, %v1483_v7  ;;  %v4894_v62 = vpop.f32.mrf.mxu1  ;;  %v7542_v42 = vld [vmem:[#allocation9_spill] sm:$0xff]  ;;  %v7543_v59 = vld [vmem:[#allocation12_spill] sm:$0xff] }
 0x12d   : > { %v1501_v26 = vadd.f32 %v4891_v36, %v1336_v38  ;;  %v1330_v21 = vadd.f32 %v1329_v53, %v1135_v40  ;;  %v4862_v3 = vpop.f32.mrf.mxu0  ;;  %v7541_v40 = vld [vmem:[#allocation6_spill] sm:$0xff] }
 0x12e   : > { %v1770_v4 = vand.u32 4294901760, %v6266_v49  ;;  %v6279_v0 = vsub.f32 %v1638_v43, %v6268_v57  ;;  %v6281_v1 = vand.u32 4294901760, %v1641_v58  ;;  %v1640_v2 = vmax.f32 %v1624_v55, 0.0  ;;  %4995 = vmatprep.mubr.f32.mxu1 %v6268_v57  ;;  %v1506_v28 = vpop.f32.mrf.mxu1 }
 0x12f   : > { %v6287_v41 = vadd.f32 %v6244_v15, %v1501_v26  ;;  %v1495_v52 = vadd.f32 %v1494_v19, %v1330_v21  ;;  %v1348_v6 = vadd.f32 %v4862_v3, %v1159_v35  ;;  %v1341_v29 = vpop.f32.mrf.mxu0  ;;  %4996 = vmatmul.mubr.f32.vlgmr.msra.gmra.mxu1 %v6255_v14  ;;  %v6331_v55 = vadd.f32 %v6217_v8, %v1026_v61 }
 0x130   : > { %v1771_v13 = vsub.f32 %v6266_v49, %v1770_v4  ;;  %v6294_v30 = vsub.f32 %v1641_v58, %v6281_v1  ;;  %v6296_v50 = vand.u32 4294901760, %v1640_v2  ;;  %v1342_v31 = vadd.f32 %v1341_v29, %v1151_v20  ;;  %5076 = vmatpush3.msra.mxu1 %v7540_v34  ;;  %v4897_v44 = vpop.f32.mrf.mxu1 }
 0x131   : > { %v1643_v25 = vmax.f32 %v6287_v41, 0.0  ;;  %v1626_v45 = vadd.f32 %v6244_v15, %v1495_v52  ;;  %v1513_v63 = vadd.f32 %v4894_v62, %v1348_v6  ;;  %v4865_v17 = vpop.f32.mrf.mxu0  ;;  %5077 = vmatprep.subr.mxu1 %v7541_v40  ;;  %v1760_v48 = vand.u32 4294901760, %v6279_v0  ;;  %v7544_v52 = vld [vmem:[#allocation5_spill] sm:$0xff]  ;;  %v7545_v6 = vld [vmem:[#allocation15_spill] sm:$0xff] }
 0x132   : > { %v6304_v39 = vsub.f32 %v1640_v2, %v6296_v50  ;;  %v1507_v9 = vadd.f32 %v1506_v28, %v1342_v31  ;;  %v1360_v12 = vadd.f32 %v4865_v17, %v1175_v5  ;;  %4998 = vmatprep.mubr.f32.mxu1 %v6296_v50  ;;  %5078 = vmatpush3.msra.mxu1 %v7541_v40  ;;  %v1518_v35 = vpop.f32.mrf.mxu1  ;;  %v1772_v60 = vand.u32 4294901760, %v1771_v13 }
 0x133   : > { %v1642_v27 = vmax.f32 %v1626_v45, 0.0  ;;  %v6309_v10 = vadd.f32 %v6244_v15, %v1513_v63  ;;  %v1353_v18 = vpop.f32.mrf.mxu0  ;;  %4999 = vmatmul.mubr.f32.gmra.mxu1 %v6281_v1  ;;  %5079 = vmatprep.subr.mxu1 %v7542_v42  ;;  %v1761_v37 = vsub.f32 %v6279_v0, %v1760_v48  ;;  %v6319_v22 = vand.u32 4294901760, %v1643_v25 }
 0x134   : > { %v1628_v54 = vadd.f32 %v6244_v15, %v1507_v9  ;;  %v1525_v51 = vadd.f32 %v4897_v44, %v1360_v12  ;;  %v1354_v36 = vadd.f32 %v1353_v18, %v1167_v47  ;;  %5080 = vmatpush3.msra.mxu1 %v7542_v42  ;;  %v4900_v20 = vpop.f32.mrf.mxu1  ;;  %v1780_v5 = vand.u32 4294901760, %v6304_v39  ;;  %v7546_v44 = vld [vmem:[#allocation54_spill] sm:$0xff] }
 0x135   : > { %v6321_v24 = vand.u32 4294901760, %v1642_v27  ;;  %v1645_v23 = vmax.f32 %v6309_v10, 0.0  ;;  %v4868_v43 = vpop.f32.mrf.mxu0  ;;  %5081 = vmatprep.subr.mxu1 %v7543_v59  ;;  %v1762_v7 = vand.u32 4294901760, %v1761_v37  ;;  %v1790_v3 = vand.u32 4294901760, %v6294_v30 }
 0x136   : > { %v1644_v19 = vmax.f32 %v1628_v54, 0.0  ;;  %v6326_v38 = vadd.f32 %v6244_v15, %v1525_v51  ;;  %v1519_v47 = vadd.f32 %v1518_v35, %v1354_v36  ;;  %v1372_v53 = vadd.f32 %v4868_v43, %v6260_v46  ;;  %5082 = vmatpush3.msra.mxu1 %v7543_v59  ;;  %v1530_v58 = vpop.f32.mrf.mxu1 }
 0x137   : > { %v6334_v62 = vsub.f32 %v1642_v27, %v6321_v24  ;;  %4939 = vmatprep.mubr.f32.mxu0 %v1762_v7  ;;  %5001 = vmatprep.mubr.f32.mxu1 %v6321_v24  ;;  %v1365_v26 = vpop.f32.mrf.mxu0  ;;  %v1781_v21 = vsub.f32 %v6304_v39, %v1780_v5  ;;  %v6347_v61 = vsub.f32 %v1643_v25, %v6319_v22  ;;  %v6357_v63 = vand.u32 4294901760, %v1645_v23 }
 0x138   : > { %v6341_v46 = vand.u32 4294901760, %v1644_v19  ;;  %v1647_v2 = vmax.f32 %v6326_v38, 0.0  ;;  %v1630_v8 = vadd.f32 %v6244_v15, %v1519_v47  ;;  %v1537_v28 = vadd.f32 %v4900_v20, %v1372_v53  ;;  %4940 = vmatmul.mubr.f32.vlgmr.msra.gmra.mxu0 %v1772_v60  ;;  %5002 = vmatmul.mubr.f32.gmra.mxu1 %v6319_v22  ;;  %v4903_v33 = vpop.f32.mrf.mxu1  ;;  %v7549_v20 = vld [vmem:[#allocation11_spill] sm:$0xff]  ;;  %v7550_v38 = vld [vmem:[#allocation53_spill] sm:$0xff] }
 0x139   : > { %v1366_v41 = vadd.f32 %v1365_v26, %v6263_v56  ;;  %5020 = vmatpush3.msra.mxu0 %v7544_v52  ;;  %5083 = vmatprep.subr.mxu1 %v7545_v6  ;;  %v4871_v29 = vpop.f32.mrf.mxu0  ;;  %v1782_v13 = vand.u32 4294901760, %v1781_v21  ;;  %v1791_v31 = vsub.f32 %v6294_v30, %v1790_v3  ;;  %v1019_v45 = vadd.f32 %v7546_v44, %v6246_v11  ;;  %v7547_v56 = vld [vmem:[#allocation8_spill] sm:$0xff]  ;;  %v7548_v11 = vld [vmem:[#allocation17_spill] sm:$0xff] }
 0x13a   : > { %v1646_v17 = vmax.f32 %v1630_v8, 0.0  ;;  %v6360_v25 = vadd.f32 %v6244_v15, %v1537_v28  ;;  %5021 = vmatprep.subr.mxu0 %v7547_v56  ;;  %5084 = vmatpush3.msra.mxu1 %v7545_v6  ;;  %v1542_v9 = vpop.f32.mrf.mxu1  ;;  %v6365_v12 = vsub.f32 %v1644_v19, %v6341_v46  ;;  %v1384_v60 = vadd.f32 %v4871_v29, %v6272_v16  ;;  %v7551_v28 = vld [vmem:[#allocation20_spill] sm:$0xff]  ;;  %v7552_v29 = vld [vmem:[#allocation14_spill] sm:$0xff] }
 0x13b   : > { %v1531_v35 = vadd.f32 %v1530_v58, %v1366_v41  ;;  %5022 = vmatpush3.msra.mxu0 %v7547_v56  ;;  %5085 = vmatprep.subr.mxu1 %v7548_v11  ;;  %v1377_v27 = vpop.f32.mrf.mxu0  ;;  %v1800_v10 = vand.u32 4294901760, %v6334_v62  ;;  %v6371_v18 = vand.u32 4294901760, %v1647_v2  ;;  %v1792_v51 = vand.u32 4294901760, %v1791_v31 }
 0x13c   : > { %v6373_v37 = vand.u32 4294901760, %v1646_v17  ;;  %4942 = vmatprep.mubr.f32.mxu0 %v1782_v13  ;;  %5004 = vmatprep.mubr.f32.mxu1 %v6341_v46  ;;  %v1378_v54 = vadd.f32 %v1377_v27, %v6275_v32  ;;  %v1549_v16 = vadd.f32 %v4903_v33, %v1384_v60  ;;  %v1810_v19 = vand.u32 4294901760, %v6347_v61  ;;  %v4906_v26 = vpop.f32.mrf.mxu1 }
 0x13d   : > { %v1632_v36 = vadd.f32 %v6244_v15, %v1531_v35  ;;  %5023 = vmatprep.subr.mxu0 %v7549_v20  ;;  %5086 = vmatpush3.msra.mxu1 %v7548_v11  ;;  %v4874_v43 = vpop.f32.mrf.mxu0  ;;  %v1801_v7 = vsub.f32 %v6334_v62, %v1800_v10  ;;  %v1215_v47 = vadd.f32 %v7550_v38, %v1019_v45  ;;  %v1649_v32 = vmax.f32 %v6360_v25, 0.0  ;;  %v7553_v25 = vld [vmem:[#allocation24_spill] sm:$0xff] }
 0x13e   : > { %v6386_v53 = vsub.f32 %v1645_v23, %v6357_v63  ;;  %v1543_v58 = vadd.f32 %v1542_v9, %v1378_v54  ;;  %4943 = vmatmul.mubr.f32.gmra.mxu0 %v1792_v51  ;;  %5005 = vmatmul.mubr.f32.gmra.mxu1 %v6357_v63  ;;  %v6391_v21 = vsub.f32 %v1646_v17, %v6373_v37  ;;  %v1820_v31 = vand.u32 4294901760, %v6365_v12  ;;  %v1554_v35 = vpop.f32.mrf.mxu1  ;;  %v7554_v54 = vld [vmem:[#allocation18_spill] sm:$0xff] }
 0x13f   : > { %v1648_v8 = vmax.f32 %v1632_v36, 0.0  ;;  %5024 = vmatpush3.msra.mxu0 %v7549_v20  ;;  %5087 = vmatprep.subr.mxu1 %v7551_v28  ;;  %v1802_v33 = vand.u32 4294901760, %v1801_v7  ;;  %v1389_v41 = vpop.f32.mrf.mxu0  ;;  %v1811_v23 = vsub.f32 %v6347_v61, %v1810_v19  ;;  %v1396_v13 = vadd.f32 %v4874_v43, %v6331_v55 }
 0x140   : > { %v1634_v52 = vadd.f32 %v6244_v15, %v1543_v58  ;;  %5025 = vmatprep.subr.mxu0 %v7552_v29  ;;  %5088 = vmatpush3.msra.mxu1 %v7551_v28  ;;  %v6404_v44 = vsub.f32 %v1647_v2, %v6371_v18  ;;  %v1635_v17 = vadd.f32 %v6244_v15, %v1549_v16  ;;  %v7464_v60 = vand.u32 4294901760, %v6386_v53 }
 0x141   : > { %v6406_v45 = vand.u32 4294901760, %v1648_v8  ;;  %5026 = vmatpush3.msra.mxu0 %v7552_v29  ;;  %5089 = vmatprep.subr.mxu1 %v7553_v25  ;;  %v1390_v56 = vadd.f32 %v1389_v41, %v1215_v47  ;;  %v1812_v55 = vand.u32 4294901760, %v1811_v23  ;;  %v1821_v2 = vsub.f32 %v6365_v12, %v1820_v31  ;;  %v7555_v47 = vld [vmem:[#allocation27_spill] sm:$0xff] }
 0x142   : > { %v1650_v9 = vmax.f32 %v1634_v52, 0.0  ;;  %4945 = vmatprep.mubr.f32.mxu0 %v1802_v33  ;;  %5007 = vmatprep.mubr.f32.mxu1 %v6373_v37  ;;  %v6416_v27 = vand.u32 4294901760, %v1649_v32  ;;  %v7460_v36 = vand.u32 4294901760, %v6391_v21  ;;  %v1561_v20 = vadd.f32 %v4906_v26, %v1396_v13  ;;  %v7557_v52 = vld [vmem:[#allocation30_spill] sm:$0xff] }
 0x143   : > { %5027 = vmatprep.subr.mxu0 %v7554_v54  ;;  %5090 = vmatpush3.msra.mxu1 %v7553_v25  ;;  %v1555_v51 = vadd.f32 %v1554_v35, %v1390_v56  ;;  %v6422_v16 = vsub.f32 %v1648_v8, %v6406_v45  ;;  %v1822_v43 = vand.u32 4294901760, %v1821_v2  ;;  %v1831_v7 = vsub.f32 %v6386_v53, %v7464_v60  ;;  %v7556_v8 = vld [vmem:[#allocation19_spill] sm:$0xff] }
 0x144   : > { %4946 = vmatmul.mubr.f32.gmra.mxu0 %v1812_v55  ;;  %5008 = vmatmul.mubr.f32.gmra.mxu1 %v6371_v18  ;;  %v1651_v58 = vmax.f32 %v1635_v17, 0.0  ;;  %v6431_v33 = vand.u32 4294901760, %v1650_v9  ;;  %v1841_v26 = vsub.f32 %v6391_v21, %v7460_v36  ;;  %v7459_v41 = vand.u32 4294901760, %v6404_v44  ;;  %v7558_v35 = vld [vmem:[#allocation23_spill] sm:$0xff]  ;;  %v7566_v36 = vld [vmem:[#allocation34_spill] sm:$0xff] }
 0x145   : > { %v1636_v38 = vadd.f32 %v6244_v15, %v1555_v51  ;;  %5028 = vmatpush3.msra.mxu0 %v7554_v54  ;;  %5091 = vmatprep.subr.mxu1 %v7555_v47  ;;  %v6440_v23 = vsub.f32 %v1649_v32, %v6416_v27  ;;  %v1637_v29 = vadd.f32 %v6244_v15, %v1561_v20  ;;  %v1832_v17 = vand.u32 4294901760, %v1831_v7  ;;  %v7559_v54 = vld [vmem:[#allocation32_spill] sm:$0xff] }
 0x146   : > { %5029 = vmatprep.subr.mxu0 %v7556_v8  ;;  %5092 = vmatpush3.msra.mxu1 %v7555_v47  ;;  %v7457_v56 = vand.u32 4294901760, %v6422_v16  ;;  %v6449_v55 = vand.u32 4294901760, %v1651_v58  ;;  %v6452_v32 = vsub.f32 %v1650_v9, %v6431_v33  ;;  %v1842_v15 = vand.u32 4294901760, %v1841_v26 }
 0x147   : > { %5030 = vmatpush3.msra.mxu0 %v7556_v8  ;;  %5093 = vmatprep.subr.mxu1 %v7557_v52  ;;  %v1652_v13 = vmax.f32 %v1636_v38, 0.0  ;;  %v1851_v2 = vsub.f32 %v6404_v44, %v7459_v41  ;;  %v1653_v51 = vmax.f32 %v1637_v29, 0.0  ;;  %v7458_v7 = vand.u32 4294901760, %v6440_v23  ;;  %v7561_v38 = vld [vmem:[#allocation35_spill] sm:$0xff] }
 0x148   : > { %4948 = vmatprep.mubr.f32.mxu0 %v1822_v43  ;;  %5010 = vmatprep.mubr.f32.mxu1 %v6406_v45  ;;  %v7560_v43 = vld [vmem:[#allocation26_spill] sm:$0xff]  ;;  %v1861_v9 = vsub.f32 %v6422_v16, %v7457_v56  ;;  %v6471_v8 = vsub.f32 %v1651_v58, %v6449_v55  ;;  %v7461_v29 = vand.u32 4294901760, %v6452_v32 }
 0x149   : > { %5031 = vmatprep.subr.mxu0 %v7558_v35  ;;  %5094 = vmatpush3.msra.mxu1 %v7557_v52  ;;  %v6460_v20 = vand.u32 4294901760, %v1652_v13  ;;  %v1852_v26 = vand.u32 4294901760, %v1851_v2  ;;  %v7563_v2 = vld [vmem:[#allocation39_spill] sm:$0xff] }
 0x14a   : > { %4949 = vmatmul.mubr.f32.gmra.mxu0 %v1832_v17  ;;  %5011 = vmatmul.mubr.f32.gmra.mxu1 %v6416_v27  ;;  %v7562_v17 = vld [vmem:[#allocation29_spill] sm:$0xff]  ;;  %v1862_v58 = vand.u32 4294901760, %v1861_v9  ;;  %v7565_v9 = vld [vmem:[#allocation42_spill] sm:$0xff] }
 0x14b   : > { %5032 = vmatpush3.msra.mxu0 %v7558_v35  ;;  %5095 = vmatprep.subr.mxu1 %v7559_v54  ;;  %v6477_v35 = vand.u32 4294901760, %v1653_v51  ;;  %v6480_v56 = vsub.f32 %v1652_v13, %v6460_v20  ;;  %v1881_v13 = vsub.f32 %v6452_v32, %v7461_v29 }
 0x14c   : > { %5033 = vmatprep.subr.mxu0 %v7560_v43  ;;  %5096 = vmatpush3.msra.mxu1 %v7559_v54 }
 0x14d   : > { %5034 = vmatpush3.msra.mxu0 %v7560_v43  ;;  %5097 = vmatprep.subr.mxu1 %v7561_v38  ;;  %v7564_v43 = vld [vmem:[#allocation33_spill] sm:$0xff]  ;;  %v7463_v41 = vand.u32 4294901760, %v6480_v56  ;;  %v1882_v29 = vand.u32 4294901760, %v1881_v13  ;;  %v7569_v13 = vld [vmem:[#allocation48_spill] sm:$0xff] }
 0x14e   : > { %4951 = vmatprep.mubr.f32.mxu0 %v1842_v15  ;;  %5013 = vmatprep.mubr.f32.mxu1 %v6431_v33  ;;  %v1871_v15 = vsub.f32 %v6440_v23, %v7458_v7  ;;  %v6497_v7 = vsub.f32 %v1653_v51, %v6477_v35  ;;  %v7567_v51 = vld [vmem:[#allocation45_spill] sm:$0xff] }
 0x14f   : > { %5035 = vmatprep.subr.mxu0 %v7562_v17  ;;  %5098 = vmatpush3.msra.mxu1 %v7561_v38 }
 0x150   : > { %4952 = vmatmul.mubr.f32.gmra.mxu0 %v1852_v26  ;;  %5014 = vmatmul.mubr.f32.gmra.mxu1 %v6449_v55  ;;  %v7462_v26 = vand.u32 4294901760, %v6471_v8 }
 0x151   : > { %5036 = vmatpush3.msra.mxu0 %v7562_v17  ;;  %5099 = vmatprep.subr.mxu1 %v7563_v2  ;;  %v1872_v17 = vand.u32 4294901760, %v1871_v15  ;;  %v1901_v15 = vsub.f32 %v6480_v56, %v7463_v41 }
 0x152   : > { %5037 = vmatprep.subr.mxu0 %v7564_v43  ;;  %5100 = vmatpush3.msra.mxu1 %v7563_v2 }
 0x153   : > { %5038 = vmatpush3.msra.mxu0 %v7564_v43  ;;  %5101 = vmatprep.subr.mxu1 %v7565_v9  ;;  %v1891_v43 = vsub.f32 %v6471_v8, %v7462_v26  ;;  %v7570_v26 = vld [vmem:[#allocation41_spill] sm:$0xff]  ;;  %v1902_v41 = vand.u32 4294901760, %v1901_v15 }
 0x154   : > { %4954 = vmatprep.mubr.f32.mxu0 %v1862_v58  ;;  %5016 = vmatprep.mubr.f32.mxu1 %v6460_v20  ;;  %v7568_v58 = vld [vmem:[#allocation38_spill] sm:$0xff] }
 0x155   : > { %5039 = vmatprep.subr.mxu0 %v7566_v36  ;;  %5102 = vmatpush3.msra.mxu1 %v7565_v9 }
 0x156   : > { %4955 = vmatmul.mubr.f32.gmra.mxu0 %v1872_v17  ;;  %5017 = vmatmul.mubr.f32.gmra.mxu1 %v6477_v35  ;;  %v1910_v17 = vand.u32 4294901760, %v6497_v7 }
 0x157   : > { %5040 = vmatpush3.msra.mxu0 %v7566_v36  ;;  %5103 = vmatprep.subr.mxu1 %v7567_v51  ;;  %v1892_v36 = vand.u32 4294901760, %v1891_v43 }
 0x158   : > { %5041 = vmatprep.subr.mxu0 %v7568_v58  ;;  %5104 = vmatpush3.msra.mxu1 %v7567_v51  ;;  %v1911_v60 = vsub.f32 %v6497_v7, %v1910_v17 }
 0x159   : > { %5107 = vmatprep.mubr.f32.mxu1 %v1760_v48  ;;  %5042 = vmatpush3.msra.mxu0 %v7568_v58  ;;  %v7571_v48 = vld [vmem:[#allocation44_spill] sm:$0xff] }
 0x15a   : > { %5105 = vmatprep.subr.mxu1 %v7569_v13  ;;  %4957 = vmatprep.mubr.f32.mxu0 %v1882_v29  ;;  %v7572_v29 = vld [vmem:[#allocation47_spill] sm:$0xff] }
 0x15b   : > { %5043 = vmatprep.subr.mxu0 %v7570_v26  ;;  %5106 = vmatpush3.msra.mxu1 %v7569_v13 }
 0x15c   : > { %4958 = vmatmul.mubr.f32.gmra.mxu0 %v1892_v36  ;;  %5108 = vmatmul.mubr.f32.vlgmr.msra.gmra.mxu1 %v1770_v4  ;;  %v1912_v4 = vand.u32 4294901760, %v1911_v60  ;;  %v7596_v60 = vld [vmem:[#allocation49_spill] sm:$0xff] }
 0x15d   : > { %5044 = vmatpush3.msra.mxu0 %v7570_v26  ;;  %5187 = vmatprep.subr.mxu1 %v7540_v34 }
 0x15e   : > { %5045 = vmatprep.subr.mxu0 %v7571_v48  ;;  %5110 = vmatprep.mubr.f32.mxu1 %v1780_v5  ;;  %v7573_v5 = vld [vmem:[#allocation50_spill] sm:$0xff] }
 0x15f   : > { %5188 = vmatpush3.msra.mxu1 %v7540_v34  ;;  %5046 = vmatpush3.msra.mxu0 %v7571_v48  ;;  %v7574_v34 = vld [vmem:[#allocation7_spill] sm:$0xff] }
 0x160   : > { %5189 = vmatprep.subr.mxu1 %v7541_v40  ;;  %4960 = vmatprep.mubr.f32.mxu0 %v1902_v41 }
 0x161   : > { %5047 = vmatprep.subr.mxu0 %v7572_v29  ;;  %5190 = vmatpush3.msra.mxu1 %v7541_v40  ;;  %v7577_v40 = vand.u32 4294901760, %v6386_v53 }
 0x162   : > { %4961 = vmatmul.mubr.f32.gmra.mxu0 %v1912_v4  ;;  %5111 = vmatmul.mubr.f32.gmra.mxu1 %v1790_v3  ;;  %v7583_v3 = vld [vmem:[#allocation22_spill] sm:$0xff] }
 0x163   : > { %5048 = vmatpush3.msra.mxu0 %v7572_v29  ;;  %5191 = vmatprep.subr.mxu1 %v7542_v42 }
 0x164   : > { %5049 = vmatprep.subr.mxu0 %v7573_v5  ;;  %5051 = vmatprep.mubr.f32.mxu0 %v6279_v0  ;;  %v7575_v0 = vld [vmem:[#allocation10_spill] sm:$0xff] }
 0x165   : > { %5113 = vmatprep.mubr.f32.mxu1 %v1800_v10  ;;  %5192 = vmatpush3.msra.mxu1 %v7542_v42  ;;  %v7579_v42 = vld [vmem:[#allocation16_spill] sm:$0xff]  ;;  %v7588_v10 = vld [vmem:[#allocation31_spill] sm:$0xff] }
 0x166   : > { %5050 = vmatpush3.msra.mxu0 %v7573_v5  ;;  %5193 = vmatprep.subr.mxu1 %v7543_v59 }
 0x167   : > { %5131 = vmatprep.subr.mxu0 %v7574_v34  ;;  %5194 = vmatpush3.msra.mxu1 %v7543_v59  ;;  %v7581_v59 = vand.u32 4294901760, %v6404_v44 }
 0x168   : > { %5052 = vmatmul.mubr.f32.vlgmr.msra.gmra.mxu0 %v6266_v49  ;;  %5114 = vmatmul.mubr.f32.gmra.mxu1 %v1810_v19  ;;  %v7576_v49 = vld [vmem:[#allocation13_spill] sm:$0xff]  ;;  %v7589_v19 = vand.u32 4294901760, %v6471_v8 }
 0x169   : > { %5132 = vmatpush3.msra.mxu0 %v7574_v34  ;;  %5195 = vmatprep.subr.mxu1 %v7545_v6 }
 0x16a   : > { %5054 = vmatprep.mubr.f32.mxu0 %v6304_v39  ;;  %5116 = vmatprep.mubr.f32.mxu1 %v1820_v31  ;;  %v7578_v39 = vand.u32 4294901760, %v6391_v21  ;;  %v7593_v31 = vld [vmem:[#allocation40_spill] sm:$0xff] }
 0x16b   : > { %5133 = vmatprep.subr.mxu0 %v7575_v0  ;;  %5196 = vmatpush3.msra.mxu1 %v7545_v6  ;;  %v7585_v6 = vand.u32 4294901760, %v6440_v23 }
 0x16c   : > { %5134 = vmatpush3.msra.mxu0 %v7575_v0  ;;  %5197 = vmatprep.subr.mxu1 %v7548_v11 }
 0x16d   : > { %5135 = vmatprep.subr.mxu0 %v7576_v49  ;;  %5198 = vmatpush3.msra.mxu1 %v7548_v11  ;;  %v7587_v11 = vld [vmem:[#allocation28_spill] sm:$0xff] }
 0x16e   : > { %5055 = vmatmul.mubr.f32.gmra.mxu0 %v6294_v30  ;;  %5117 = vmatmul.mubr.f32.gmra.mxu1 %v7577_v40  ;;  %v7580_v30 = vld [vmem:[#allocation21_spill] sm:$0xff] }
 0x16f   : > { %5136 = vmatpush3.msra.mxu0 %v7576_v49  ;;  %5199 = vmatprep.subr.mxu1 %v7551_v28 }
 0x170   : > { %5057 = vmatprep.mubr.f32.mxu0 %v6334_v62  ;;  %5119 = vmatprep.mubr.f32.mxu1 %v7578_v39  ;;  %v7582_v62 = vand.u32 4294901760, %v6422_v16 }
 0x171   : > { %5137 = vmatprep.subr.mxu0 %v7579_v42  ;;  %5200 = vmatpush3.msra.mxu1 %v7551_v28  ;;  %v7592_v28 = vld [vmem:[#allocation37_spill] sm:$0xff] }
 0x172   : > { %5138 = vmatpush3.msra.mxu0 %v7579_v42  ;;  %5201 = vmatprep.subr.mxu1 %v7553_v25 }
 0x173   : > { %5139 = vmatprep.subr.mxu0 %v7580_v30  ;;  %5202 = vmatpush3.msra.mxu1 %v7553_v25  ;;  %v7595_v25 = vld [vmem:[#allocation46_spill] sm:$0xff] }
 0x174   : > { %5058 = vmatmul.mubr.f32.gmra.mxu0 %v6347_v61  ;;  %5120 = vmatmul.mubr.f32.gmra.mxu1 %v7581_v59  ;;  %v7584_v61 = vld [vmem:[#allocation25_spill] sm:$0xff] }
 0x175   : > { %5140 = vmatpush3.msra.mxu0 %v7580_v30  ;;  %5203 = vmatprep.subr.mxu1 %v7555_v47 }
 0x176   : > { %5060 = vmatprep.mubr.f32.mxu0 %v6365_v12  ;;  %5122 = vmatprep.mubr.f32.mxu1 %v7582_v62  ;;  %v7586_v12 = vand.u32 4294901760, %v6452_v32 }
 0x177   : > { %5141 = vmatprep.subr.mxu0 %v7583_v3  ;;  %5204 = vmatpush3.msra.mxu1 %v7555_v47  ;;  %v2979_v47 = vld [vmem:[%s7359_s5] sm:$0xff] }
 0x178   : > { %5142 = vmatpush3.msra.mxu0 %v7583_v3  ;;  %5205 = vmatprep.subr.mxu1 %v7557_v52  ;;  %v6713_v41 = vand.u32 4294901760, %v2979_v47 }
 0x179   : > { %5143 = vmatprep.subr.mxu0 %v7584_v61  ;;  %5206 = vmatpush3.msra.mxu1 %v7557_v52 }
 0x17a   : > { %5061 = vmatmul.mubr.f32.gmra.mxu0 %v6386_v53  ;;  %5123 = vmatmul.mubr.f32.gmra.mxu1 %v7585_v6  ;;  %v7590_v53 = vand.u32 4294901760, %v6480_v56  ;;  %7606 = vst [vmem:[#allocation8_spill] sm:$0xff] %v6713_v41 }
 0x17b   : > { %5144 = vmatpush3.msra.mxu0 %v7584_v61  ;;  %5207 = vmatprep.subr.mxu1 %v7559_v54 }
 0x17c   : > { %5063 = vmatprep.mubr.f32.mxu0 %v6391_v21  ;;  %5125 = vmatprep.mubr.f32.mxu1 %v7586_v12  ;;  %v7591_v21 = vld [vmem:[#allocation36_spill] sm:$0xff] }
 0x17d   : > { %5145 = vmatprep.subr.mxu0 %v7587_v11  ;;  %5208 = vmatpush3.msra.mxu1 %v7559_v54 }
 0x17e   : > { %5146 = vmatpush3.msra.mxu0 %v7587_v11  ;;  %5209 = vmatprep.subr.mxu1 %v7561_v38 }
 0x17f   : > { %5147 = vmatprep.subr.mxu0 %v7588_v10  ;;  %5210 = vmatpush3.msra.mxu1 %v7561_v38 }
 0x180   : > { %5064 = vmatmul.mubr.f32.gmra.mxu0 %v6404_v44  ;;  %5126 = vmatmul.mubr.f32.gmra.mxu1 %v7589_v19  ;;  %v7594_v44 = vld [vmem:[#allocation43_spill] sm:$0xff] }
 0x181   : > { %5148 = vmatpush3.msra.mxu0 %v7588_v10  ;;  %5211 = vmatprep.subr.mxu1 %v7563_v2 }
 0x182   : > { %5066 = vmatprep.mubr.f32.mxu0 %v6422_v16  ;;  %5128 = vmatprep.mubr.f32.mxu1 %v7590_v53  ;;  %v7597_v16 = vld [vmem:[#allocation51_spill] sm:$0xff] }
 0x183   : > { %5149 = vmatprep.subr.mxu0 %v7591_v21  ;;  %5212 = vmatpush3.msra.mxu1 %v7563_v2 }
 0x184   : > { %5150 = vmatpush3.msra.mxu0 %v7591_v21  ;;  %5213 = vmatprep.subr.mxu1 %v7565_v9 }
 0x185   : > { %5151 = vmatprep.subr.mxu0 %v7592_v28  ;;  %5214 = vmatpush3.msra.mxu1 %v7565_v9 }
 0x186   : > { %5067 = vmatmul.mubr.f32.gmra.mxu0 %v6440_v23  ;;  %5129 = vmatmul.mubr.f32.gmra.mxu1 %v1910_v17 }
 0x187   : > { %5152 = vmatpush3.msra.mxu0 %v7592_v28  ;;  %5215 = vmatprep.subr.mxu1 %v7567_v51 }
 0x188   : > { %5069 = vmatprep.mubr.f32.mxu0 %v6452_v32  ;;  %5153 = vmatprep.subr.mxu0 %v7593_v31 }
 0x189   : > { %5216 = vmatpush3.msra.mxu1 %v7567_v51  ;;  %5219 = vmatprep.mubr.f32.mxu1 %v6268_v57 }
 0x18a   : > { %5154 = vmatpush3.msra.mxu0 %v7593_v31  ;;  %5217 = vmatprep.subr.mxu1 %v7569_v13 }
 0x18b   : > { %5155 = vmatprep.subr.mxu0 %v7594_v44  ;;  %5218 = vmatpush3.msra.mxu1 %v7569_v13 }
 0x18c   : > { %5070 = vmatmul.mubr.f32.gmra.mxu0 %v6471_v8  ;;  %5220 = vmatmul.mubr.f32.vlgmr.msra.gmra.mxu1 %v6255_v14 }
 0x18d   : > { %5156 = vmatpush3.msra.mxu0 %v7594_v44  ;;  %5072 = vmatprep.mubr.f32.mxu0 %v6480_v56  ;;  %v6722_v56 = vsub.f32 %v2979_v47, %v6713_v41 }
 0x18e   : > { %5157 = vmatprep.subr.mxu0 %v7595_v25  ;;  %5222 = vmatprep.mubr.f32.mxu1 %v6296_v50 }
 0x18f   : > { %5158 = vmatpush3.msra.mxu0 %v7595_v25  ;;  %7608 = vst [vmem:[#allocation11_spill] sm:$0xff] %v6722_v56  ;;  %v6729_v54 = vand.u32 4294901760, %v6722_v56 }
 0x190   : > { %5159 = vmatprep.subr.mxu0 %v7596_v60  ;;  %5073 = vmatmul.mubr.f32.gmra.mxu0 %v6497_v7 }
 0x191   : > { %5160 = vmatpush3.msra.mxu0 %v7596_v60  ;;  %5223 = vmatmul.mubr.f32.gmra.mxu1 %v6281_v1  ;;  %7609 = vst [vmem:[#allocation53_spill] sm:$0xff] %v6729_v54  ;;  %v3316_v7 = vsub.f32 %v6722_v56, %v6729_v54  ;;  %v4279_v56 = vld [vmem:[%s7358_s4] ss:$0 sm:$0xff] }
 0x192   : > { %5161 = vmatprep.subr.mxu0 %v7597_v16  ;;  %5163 = vmatprep.mubr.f32.mxu0 %v6268_v57 }
 0x193   : > { %5225 = vmatprep.mubr.f32.mxu1 %v6321_v24  ;;  %5162 = vmatpush3.msra.mxu0 %v7597_v16  ;;  %v3317_v38 = vand.u32 4294901760, %v3316_v7 }
 0x194   : > { %5164 = vmatmul.mubr.f32.vlgmr.msra.gmra.mxu0 %v6255_v14  ;;  %v2982_v14 = vld [vmem:[%s7359_s5 + $0x18] sm:$0xff] }
 0x195   : > { %5226 = vmatmul.mubr.f32.gmra.mxu1 %v6319_v22  ;;  %5166 = vmatprep.mubr.f32.mxu0 %v6296_v50  ;;  %v6676_v57 = vand.u32 4294901760, %v2982_v14 }
 0x196   : > { %5228 = vmatprep.mubr.f32.mxu1 %v6341_v46 }
 0x197   : > { %7598 = vst [vmem:[#allocation52_spill] sm:$0xff] %v6676_v57  ;;  %5243 = vmatprep.subr.mxu0 %v6676_v57 }
 0x198   : > { %5167 = vmatmul.mubr.f32.gmra.mxu0 %v6281_v1  ;;  %v6680_v1 = vsub.f32 %v2982_v14, %v6676_v57 }
 0x199   : > { %5229 = vmatmul.mubr.f32.gmra.mxu1 %v6357_v63  ;;  %5169 = vmatprep.mubr.f32.mxu0 %v6321_v24 }
 0x19a   : > { %5231 = vmatprep.mubr.f32.mxu1 %v6373_v37  ;;  %7599 = vst [vmem:[#allocation4_spill] sm:$0xff] %v6680_v1  ;;  %5244 = vmatpush3.msra.mxu0 %v6676_v57  ;;  %v6684_v50 = vand.u32 4294901760, %v6680_v1 }
 0x19c   : > { %5170 = vmatmul.mubr.f32.gmra.mxu0 %v6319_v22  ;;  %7600 = vst [vmem:[#allocation6_spill] sm:$0xff] %v6684_v50  ;;  %v3295_v22 = vsub.f32 %v6680_v1, %v6684_v50 }
 0x19d   : > { %5232 = vmatmul.mubr.f32.gmra.mxu1 %v6371_v18  ;;  %5172 = vmatprep.mubr.f32.mxu0 %v6341_v46  ;;  %v2981_v46 = vld [vmem:[%s7359_s5 + $0x10] sm:$0xff] }
 0x19e   : > { %5234 = vmatprep.mubr.f32.mxu1 %v6406_v45  ;;  %v3296_v24 = vand.u32 4294901760, %v3295_v22 }
 0x1a0   : > { %5173 = vmatmul.mubr.f32.gmra.mxu0 %v6357_v63  ;;  %5275 = vmatprep.subr.mxu1 %v3296_v24  ;;  %v6691_v63 = vand.u32 4294901760, %v2981_v46 }
 0x1a1   : > { %5235 = vmatmul.mubr.f32.gmra.mxu1 %v6416_v27  ;;  %5175 = vmatprep.mubr.f32.mxu0 %v6373_v37  ;;  %v2980_v37 = vld [vmem:[%s7359_s5 + $0x8] sm:$0xff] }
 0x1a2   : > { %5237 = vmatprep.mubr.f32.mxu1 %v6431_v33  ;;  %7601 = vst [vmem:[#allocation9_spill] sm:$0xff] %v6691_v63  ;;  %5276 = vmatpush3.msra.mxu1 %v3296_v24 }
 0x1a3   : > { %5245 = vmatprep.subr.mxu0 %v6691_v63 }
 0x1a4   : > { %5176 = vmatmul.mubr.f32.gmra.mxu0 %v6371_v18  ;;  %v6695_v18 = vsub.f32 %v2981_v46, %v6691_v63 }
 0x1a5   : > { %5238 = vmatmul.mubr.f32.gmra.mxu1 %v6449_v55  ;;  %5178 = vmatprep.mubr.f32.mxu0 %v6406_v45  ;;  %v6701_v45 = vand.u32 4294901760, %v2980_v37 }
 0x1a6   : > { %5240 = vmatprep.mubr.f32.mxu1 %v6460_v20  ;;  %7602 = vst [vmem:[#allocation12_spill] sm:$0xff] %v6695_v18  ;;  %5246 = vmatpush3.msra.mxu0 %v6691_v63 }
 0x1a7   : > { %7603 = vst [vmem:[#allocation5_spill] sm:$0xff] %v6701_v45  ;;  %5247 = vmatprep.subr.mxu0 %v6701_v45 }
 0x1a8   : > { %5179 = vmatmul.mubr.f32.gmra.mxu0 %v6416_v27  ;;  %v6704_v27 = vand.u32 4294901760, %v6695_v18 }
 0x1a9   : > { %5241 = vmatmul.mubr.f32.gmra.mxu1 %v6477_v35  ;;  %5181 = vmatprep.mubr.f32.mxu0 %v6431_v33  ;;  %v6711_v33 = vsub.f32 %v2980_v37, %v6701_v45 }
 0x1aa   : > { %7604 = vst [vmem:[#allocation15_spill] sm:$0xff] %v6704_v27  ;;  %v3302_v23 = vsub.f32 %v6695_v18, %v6704_v27  ;;  %5248 = vmatpush3.msra.mxu0 %v6701_v45 }
 0x1ab   : > { %7605 = vst [vmem:[#allocation54_spill] sm:$0xff] %v6711_v33  ;;  %v6719_v52 = vand.u32 4294901760, %v6711_v33  ;;  %5249 = vmatprep.subr.mxu0 %v6713_v41 }
 0x1ac   : > { %5182 = vmatmul.mubr.f32.gmra.mxu0 %v6449_v55  ;;  %v3303_v55 = vand.u32 4294901760, %v3302_v23 }
 0x1ad   : > { %5184 = vmatprep.mubr.f32.mxu0 %v6460_v20  ;;  %7607 = vst [vmem:[#allocation17_spill] sm:$0xff] %v6719_v52  ;;  %5250 = vmatpush3.msra.mxu0 %v6713_v41  ;;  %v3309_v32 = vsub.f32 %v6711_v33, %v6719_v52 }
 0x1ae   : > { %5307 = vmatprep.subr.mxu0 %v6680_v1  ;;  %5277 = vmatprep.subr.mxu1 %v3303_v55 }
 0x1af   : > { %5278 = vmatpush3.msra.mxu1 %v3303_v55  ;;  %v3310_v20 = vand.u32 4294901760, %v3309_v32 }
 0x1b0   : > { %5185 = vmatmul.mubr.f32.gmra.mxu0 %v6477_v35 }
 0x1b1   : > { %5279 = vmatprep.subr.mxu1 %v3310_v20 }
 0x1b2   : > { %5280 = vmatpush3.msra.mxu1 %v3310_v20 }
 0x1b3   : > { %5281 = vmatprep.subr.mxu1 %v3317_v38 }
 0x1b4   : > { %5282 = vmatpush3.msra.mxu1 %v3317_v38 }
 0x1b5   : > { %5339 = vmatprep.subr.mxu1 %v6676_v57 }
 0x1ef   : > { %v6735_v8 = vpop.f32.mrf.mxu1 }
 0x1f1   : > { %v6737_v35 = vpop.f32.mrf.mxu1 }
 0x1f3   : > { %v6739_v2 = vpop.f32.mrf.mxu1 }
 0x1f5   : > { %v6741_v26 = vpop.f32.mrf.mxu1 }
 0x1f8   : > { %v4941_v9 = vpop.f32.mrf.mxu0  ;;  %v6743_v43 = vpop.f32.mrf.mxu1 }
 0x1f9   : > { %v1775_v45 = vadd.f32 %v4941_v9, %v4279_v56 }
 0x1fa   : > { %v1764_v51 = vpop.f32.mrf.mxu0  ;;  %v6745_v58 = vpop.f32.mrf.mxu1 }
 0x1fb   : > { %v1765_v63 = vadd.f32 %v4279_v56, %v1764_v51 }
 0x1fe   : > { %v4944_v15 = vpop.f32.mrf.mxu0  ;;  %v6747_v17 = vpop.f32.mrf.mxu1 }
 0x1ff   : > { %v1795_v57 = vadd.f32 %v4944_v15, %v4279_v56 }
 0x200   : > { %v1784_v13 = vpop.f32.mrf.mxu0  ;;  %v6749_v36 = vpop.f32.mrf.mxu1 }
 0x204   : > { %v4947_v48 = vpop.f32.mrf.mxu0  ;;  %v6751_v4 = vpop.f32.mrf.mxu1 }
 0x206   : > { %v1804_v29 = vpop.f32.mrf.mxu0  ;;  %v6753_v5 = vpop.f32.mrf.mxu1 }
 0x20a   : > { %v4950_v34 = vpop.f32.mrf.mxu0  ;;  %v6755_v0 = vpop.f32.mrf.mxu1 }
 0x20c   : > { %v1824_v49 = vpop.f32.mrf.mxu0  ;;  %v6757_v40 = vpop.f32.mrf.mxu1 }
 0x210   : > { %v4953_v39 = vpop.f32.mrf.mxu0  ;;  %v6759_v42 = vpop.f32.mrf.mxu1 }
 0x212   : > { %v1844_v30 = vpop.f32.mrf.mxu0  ;;  %v6761_v59 = vpop.f32.mrf.mxu1 }
 0x216   : > { %v4956_v62 = vpop.f32.mrf.mxu0  ;;  %v6763_v3 = vpop.f32.mrf.mxu1 }
 0x218   : > { %v1864_v61 = vpop.f32.mrf.mxu0  ;;  %v6765_v6 = vpop.f32.mrf.mxu1 }
 0x21c   : > { %v4959_v12 = vpop.f32.mrf.mxu0  ;;  %v6767_v11 = vpop.f32.mrf.mxu1 }
 0x21e   : > { %v1884_v10 = vpop.f32.mrf.mxu0  ;;  %v6769_v19 = vpop.f32.mrf.mxu1 }
 0x222   : > { %v4962_v53 = vpop.f32.mrf.mxu0  ;;  %v6771_v21 = vpop.f32.mrf.mxu1 }
 0x224   : > { %v1904_v28 = vpop.f32.mrf.mxu0  ;;  %v6773_v31 = vpop.f32.mrf.mxu1 }
 0x225   : > { %7610 = vst [vmem:[#allocation20_spill] sm:$0xff] %v6773_v31  ;;  %v1875_v31 = vadd.f32 %v4956_v62, %v4279_v56 }
 0x228   : > { %v5053_v44 = vpop.f32.mrf.mxu0  ;;  %v6775_v25 = vpop.f32.mrf.mxu1 }
 0x229   : > { %7611 = vst [vmem:[#allocation14_spill] sm:$0xff] %v6775_v25  ;;  %v2072_v25 = vadd.f32 %v6735_v8, %v1775_v45 }
 0x22a   : > { %v2259_v60 = vpop.f32.mrf.mxu0  ;;  %v6777_v16 = vpop.f32.mrf.mxu1 }
 0x22b   : > { %7612 = vst [vmem:[#allocation24_spill] sm:$0xff] %v6777_v16  ;;  %v1845_v16 = vadd.f32 %v4279_v56, %v1844_v30 }
 0x22e   : > { %v5056_v14 = vpop.f32.mrf.mxu0  ;;  %v6779_v22 = vpop.f32.mrf.mxu1 }
 0x22f   : > { %7613 = vst [vmem:[#allocation18_spill] sm:$0xff] %v6779_v22  ;;  %v1855_v22 = vadd.f32 %v4953_v39, %v4279_v56  ;;  %v1915_v39 = vadd.f32 %v4962_v53, %v4279_v56 }
 0x230   : > { %v2273_v24 = vpop.f32.mrf.mxu0  ;;  %v6781_v46 = vpop.f32.mrf.mxu1 }
 0x231   : > { %7614 = vst [vmem:[#allocation27_spill] sm:$0xff] %v6781_v46 }
 0x234   : > { %v5059_v37 = vpop.f32.mrf.mxu0  ;;  %v6783_v47 = vpop.f32.mrf.mxu1 }
 0x235   : > { %7615 = vst [vmem:[#allocation19_spill] sm:$0xff] %v6783_v47  ;;  %v1825_v47 = vadd.f32 %v4279_v56, %v1824_v49  ;;  %v1885_v49 = vadd.f32 %v4279_v56, %v1884_v10 }
 0x236   : > { %v2287_v23 = vpop.f32.mrf.mxu0  ;;  %v6785_v55 = vpop.f32.mrf.mxu1 }
 0x237   : > { %7616 = vst [vmem:[#allocation30_spill] sm:$0xff] %v6785_v55  ;;  %v1835_v55 = vadd.f32 %v4950_v34, %v4279_v56 }
 0x239   : > { %v2108_v45 = vadd.f32 %v6747_v17, %v1835_v55 }
 0x23a   : > { %v5062_v32 = vpop.f32.mrf.mxu0  ;;  %v6787_v20 = vpop.f32.mrf.mxu1 }
 0x23b   : > { %7617 = vst [vmem:[#allocation23_spill] sm:$0xff] %v6787_v20  ;;  %v1815_v20 = vadd.f32 %v4947_v48, %v4279_v56  ;;  %v2267_v48 = vadd.f32 %v5053_v44, %v2072_v25 }
 0x23c   : > { %v2301_v7 = vpop.f32.mrf.mxu0  ;;  %v6789_v38 = vpop.f32.mrf.mxu1 }
 0x23d   : > { %7618 = vst [vmem:[#allocation32_spill] sm:$0xff] %v6789_v38  ;;  %v1785_v38 = vadd.f32 %v4279_v56, %v1784_v13  ;;  %v1895_v13 = vadd.f32 %v4959_v12, %v4279_v56 }
 0x23f   : > { %v2078_v9 = vadd.f32 %v6741_v26, %v1785_v38  ;;  %v2144_v17 = vadd.f32 %v6759_v42, %v1895_v13 }
 0x240   : > { %v5065_v54 = vpop.f32.mrf.mxu0  ;;  %v6791_v52 = vpop.f32.mrf.mxu1 }
 0x241   : > { %7619 = vst [vmem:[#allocation26_spill] sm:$0xff] %v6791_v52  ;;  %v1805_v52 = vadd.f32 %v4279_v56, %v1804_v29  ;;  %v2096_v29 = vadd.f32 %v6743_v43, %v1815_v20  ;;  %v2132_v43 = vadd.f32 %v6755_v0, %v1875_v31 }
 0x242   : > { %v2315_v27 = vpop.f32.mrf.mxu0  ;;  %v6793_v50 = vpop.f32.mrf.mxu1 }
 0x243   : > { %7620 = vst [vmem:[#allocation35_spill] sm:$0xff] %v6793_v50  ;;  %v2090_v34 = vadd.f32 %v6745_v58, %v1805_v52  ;;  %v2295_v12 = vadd.f32 %v5059_v37, %v2096_v29  ;;  %v7626_v37 = vld [vmem:[#allocation24_spill] sm:$0xff] }
 0x245   : > { %v2288_v10 = vadd.f32 %v2287_v23, %v2090_v34  ;;  %v7631_v34 = vld [vmem:[#allocation30_spill] sm:$0xff] }
 0x246   : > { %v5068_v33 = vpop.f32.mrf.mxu0  ;;  %v6798_v18 = vpop.f32.mrf.mxu1 }
 0x247   : > { %7621 = vst [vmem:[#allocation29_spill] sm:$0xff] %v6798_v18  ;;  %v2066_v18 = vadd.f32 %v6737_v35, %v1765_v63  ;;  %v2102_v63 = vadd.f32 %v6749_v36, %v1825_v47  ;;  %v1905_v35 = vadd.f32 %v4279_v56, %v1904_v28  ;;  %v2337_v25 = vadd.f32 %v5068_v33, %v2132_v43 }
 0x248   : > { %v6800_v1 = vpop.f32.mrf.mxu0  ;;  %v6802_v41 = vpop.f32.mrf.mxu1 }
 0x249   : > { %7622 = vst [vmem:[#allocation39_spill] sm:$0xff] %v6800_v1  ;;  %7623 = vst [vmem:[#allocation33_spill] sm:$0xff] %v6802_v41  ;;  %v1865_v1 = vadd.f32 %v4279_v56, %v1864_v61  ;;  %v2084_v41 = vadd.f32 %v6739_v2, %v1795_v57  ;;  %v2260_v30 = vadd.f32 %v2259_v60, %v2066_v18 }
 0x24a   : > { %v2120_v57 = vadd.f32 %v6751_v4, %v1855_v22  ;;  %v2114_v2 = vadd.f32 %v6753_v5, %v1845_v16  ;;  %v2274_v61 = vadd.f32 %v2273_v24, %v2078_v9  ;;  %v2462_v56 = vadd.f32 %v6767_v11, %v2267_v48  ;;  %v7624_v11 = vld [vmem:[#allocation20_spill] sm:$0xff]  ;;  %v7625_v24 = vld [vmem:[#allocation14_spill] sm:$0xff]  ;;  %v7630_v9 = vld [vmem:[#allocation19_spill] sm:$0xff] }
 0x24b   : > { %v2281_v62 = vadd.f32 %v5056_v14, %v2084_v41  ;;  %v2126_v52 = vadd.f32 %v6757_v40, %v1865_v1  ;;  %v2309_v18 = vadd.f32 %v5062_v32, %v2108_v45  ;;  %v2302_v53 = vadd.f32 %v2301_v7, %v2102_v63  ;;  %v7628_v32 = vld [vmem:[#allocation18_spill] sm:$0xff] }
 0x24c   : > { %v5071_v50 = vpop.f32.mrf.mxu0  ;;  %v5221_v46 = vpop.f32.mrf.mxu1  ;;  %v2138_v4 = vadd.f32 %v6761_v59, %v1885_v49  ;;  %v2156_v5 = vadd.f32 %v6763_v3, %v1915_v39  ;;  %v2323_v28 = vadd.f32 %v5065_v54, %v2120_v57  ;;  %v2150_v0 = vadd.f32 %v6765_v6, %v1905_v35  ;;  %v7632_v39 = vld [vmem:[#allocation23_spill] sm:$0xff] }
 0x24d   : > { %v2454_v40 = vadd.f32 %v6769_v19, %v2260_v30  ;;  %v2316_v44 = vadd.f32 %v2315_v27, %v2114_v2  ;;  %v2478_v60 = vadd.f32 %v6771_v21, %v2281_v62  ;;  %v2470_v16 = vadd.f32 %v7624_v11, %v2274_v61  ;;  %v7629_v27 = vld [vmem:[#allocation27_spill] sm:$0xff]  ;;  %v7633_v61 = vld [vmem:[#allocation32_spill] sm:$0xff] }
 0x24e   : > { %v2343_v51 = vpop.f32.mrf.mxu0  ;;  %v2869_v15 = vpop.f32.mrf.mxu1  ;;  %v2494_v3 = vadd.f32 %v7625_v24, %v2295_v12  ;;  %v2486_v54 = vadd.f32 %v7626_v37, %v2288_v10  ;;  %v2351_v23 = vadd.f32 %v5071_v50, %v2144_v17  ;;  %v2510_v19 = vadd.f32 %v7628_v32, %v2309_v18 }
 0x24f   : > { %v2502_v33 = vadd.f32 %v7629_v27, %v2302_v53  ;;  %v2344_v13 = vadd.f32 %v2343_v51, %v2138_v4  ;;  %v6833_v49 = vadd.f32 %v7631_v34, %v2316_v44  ;;  %v6836_v50 = vadd.f32 %v7632_v39, %v2337_v25  ;;  %v7635_v53 = vld [vmem:[#allocation35_spill] sm:$0xff] }
 0x250   : > { %v5074_v8 = vpop.f32.mrf.mxu0  ;;  %v7627_v47 = vld [vmem:[#allocation39_spill] sm:$0xff]  ;;  %v7637_v11 = vld [vmem:[#allocation33_spill] sm:$0xff] }
 0x251   : > { %v5224_v26 = vpop.f32.mrf.mxu1  ;;  %v2330_v6 = vadd.f32 %v7627_v47, %v2126_v52  ;;  %v2365_v48 = vadd.f32 %v5074_v8, %v2156_v5  ;;  %v7634_v8 = vld [vmem:[#allocation26_spill] sm:$0xff]  ;;  %v6854_v4 = vadd.f32 %v7635_v53, %v2344_v13  ;;  %v7636_v5 = vld [vmem:[#allocation29_spill] sm:$0xff] }
 0x252   : > { %v2357_v58 = vpop.f32.mrf.mxu0  ;;  %v6845_v43 = vadd.f32 %v7634_v8, %v2351_v23 }
 0x253   : > { %v2881_v36 = vpop.f32.mrf.mxu1  ;;  %v2358_v57 = vadd.f32 %v2357_v58, %v2150_v0  ;;  %v6842_v51 = vadd.f32 %v7633_v61, %v2330_v6 }
 0x254   : > { %v5165_v41 = vpop.f32.mrf.mxu0 }
 0x255   : > { %v2699_v31 = vadd.f32 %v5165_v41, %v2462_v56  ;;  %v5227_v1 = vpop.f32.mrf.mxu1  ;;  %v6857_v41 = vadd.f32 %v7636_v5, %v2365_v48 }
 0x256   : > { %v2692_v42 = vpop.f32.mrf.mxu0 }
 0x257   : > { %v2876_v14 = vadd.f32 %v5221_v46, %v2699_v31  ;;  %v2693_v22 = vadd.f32 %v2692_v42, %v2454_v40  ;;  %v2893_v59 = vpop.f32.mrf.mxu1  ;;  %v6830_v46 = vadd.f32 %v7630_v9, %v2323_v28 }
 0x258   : > { %v5168_v55 = vpop.f32.mrf.mxu0 }
 0x259   : > { %v2964_v20 = vmax.f32 %v2876_v14, 0.0  ;;  %v2870_v7 = vadd.f32 %v2869_v15, %v2693_v22  ;;  %v2711_v21 = vadd.f32 %v5168_v55, %v2478_v60  ;;  %v5230_v38 = vpop.f32.mrf.mxu1  ;;  %v7638_v55 = vld [vmem:[#allocation52_spill] sm:$0xff] }
 0x25a   : > { %v2704_v29 = vpop.f32.mrf.mxu0 }
 0x25b   : > { %v2994_v45 = vsel %vm385_vm0, %v2964_v20, 0  ;;  %v2963_v63 = vmax.f32 %v2870_v7, 0.0  ;;  %v2888_v35 = vadd.f32 %v5224_v26, %v2711_v21  ;;  %v2705_v30 = vadd.f32 %v2704_v29, %v2470_v16  ;;  %v2905_v15 = vpop.f32.mrf.mxu1  ;;  %v7639_v20 = vld [vmem:[#allocation9_spill] sm:$0xff] }
 0x25c   : > { %v6839_v2 = vand.u32 4294901760, %v2994_v45  ;;  %v5171_v62 = vpop.f32.mrf.mxu0  ;;  %v6868_v16 = vadd.f32 %v7637_v11, %v2358_v57 }
 0x25d   : > { %v2991_v52 = vsel %vm385_vm0, %v2963_v63, 0  ;;  %v2966_v12 = vmax.f32 %v2888_v35, 0.0  ;;  %v2882_v10 = vadd.f32 %v2881_v36, %v2705_v30  ;;  %v2723_v17 = vadd.f32 %v5171_v62, %v2494_v3  ;;  %v5233_v56 = vpop.f32.mrf.mxu1 }
 0x25e   : > { %v6849_v26 = vsub.f32 %v2994_v45, %v6839_v2  ;;  %v6851_v18 = vand.u32 4294901760, %v2991_v52  ;;  %v2716_v58 = vpop.f32.mrf.mxu0  ;;  %v7640_v45 = vld [vmem:[#allocation5_spill] sm:$0xff] }
 0x25f   : > { %v3000_v28 = vsel %vm385_vm0, %v2966_v12, 0  ;;  %v2965_v0 = vmax.f32 %v2882_v10, 0.0  ;;  %v2900_v31 = vadd.f32 %v5227_v1, %v2723_v17  ;;  %v2717_v40 = vadd.f32 %v2716_v58, %v2486_v54  ;;  %v2917_v36 = vpop.f32.mrf.mxu1 }
 0x260   : > { %v3119_v44 = vand.u32 4294901760, %v6849_v26  ;;  %v6862_v25 = vsub.f32 %v2991_v52, %v6851_v18  ;;  %v6864_v42 = vand.u32 4294901760, %v3000_v28  ;;  %v5174_v60 = vpop.f32.mrf.mxu0  ;;  %5283 = vmatprep.mubr.f32.mxu1 %v6851_v18  ;;  %v7641_v52 = vld [vmem:[#allocation8_spill] sm:$0xff] }
 0x261   : > { %v2997_v14 = vsel %vm385_vm0, %v2965_v0, 0  ;;  %v2968_v22 = vmax.f32 %v2900_v31, 0.0  ;;  %v2894_v24 = vadd.f32 %v2893_v59, %v2717_v40  ;;  %v2735_v1 = vadd.f32 %v5174_v60, %v2510_v19  ;;  %v5236_v3 = vpop.f32.mrf.mxu1  ;;  %5284 = vmatmul.mubr.f32.vlgmr.msra.gmra.mxu1 %v6839_v2  ;;  %v7642_v60 = vld [vmem:[#allocation4_spill] sm:$0xff] }
 0x262   : > { %v3120_v37 = vsub.f32 %v6849_v26, %v3119_v44  ;;  %v6876_v54 = vsub.f32 %v3000_v28, %v6864_v42  ;;  %v6878_v47 = vand.u32 4294901760, %v2997_v14  ;;  %v2728_v6 = vpop.f32.mrf.mxu0  ;;  %v3109_v23 = vand.u32 4294901760, %v6862_v25  ;;  %5340 = vmatpush3.msra.mxu1 %v7638_v55 }
 0x263   : > { %v3006_v59 = vsel %vm385_vm0, %v2968_v22, 0  ;;  %v2967_v32 = vmax.f32 %v2894_v24, 0.0  ;;  %v2912_v19 = vadd.f32 %v5230_v38, %v2735_v1  ;;  %v2729_v27 = vadd.f32 %v2728_v6, %v2502_v33  ;;  %5341 = vmatprep.subr.mxu1 %v7639_v20  ;;  %v2929_v13 = vpop.f32.mrf.mxu1 }
 0x264   : > { %v3121_v7 = vand.u32 4294901760, %v3120_v37  ;;  %v6885_v21 = vsub.f32 %v2997_v14, %v6878_v47  ;;  %v6887_v9 = vand.u32 4294901760, %v3006_v59  ;;  %v5177_v48 = vpop.f32.mrf.mxu0  ;;  %5286 = vmatprep.mubr.f32.mxu1 %v6878_v47  ;;  %v3110_v29 = vsub.f32 %v6862_v25, %v3109_v23  ;;  %5342 = vmatpush3.msra.mxu1 %v7639_v20  ;;  %v7643_v37 = vld [vmem:[#allocation12_spill] sm:$0xff] }
 0x265   : > { %v3003_v33 = vsel %vm385_vm0, %v2967_v32, 0  ;;  %v2970_v38 = vmax.f32 %v2912_v19, 0.0  ;;  %v2906_v34 = vadd.f32 %v2905_v15, %v2729_v27  ;;  %v2747_v39 = vadd.f32 %v5177_v48, %v6830_v46  ;;  %5287 = vmatmul.mubr.f32.gmra.mxu1 %v6864_v42  ;;  %5343 = vmatprep.subr.mxu1 %v7640_v45  ;;  %v5239_v17 = vpop.f32.mrf.mxu1 }
 0x266   : > { %v6899_v63 = vsub.f32 %v3006_v59, %v6887_v9  ;;  %v6901_v35 = vand.u32 4294901760, %v3003_v33  ;;  %v2740_v30 = vpop.f32.mrf.mxu0  ;;  %v3111_v57 = vand.u32 4294901760, %v3110_v29  ;;  %v3129_v62 = vand.u32 4294901760, %v6885_v21  ;;  %5344 = vmatpush3.msra.mxu1 %v7640_v45 }
 0x267   : > { %v3012_v61 = vsel %vm385_vm0, %v2970_v38, 0  ;;  %v2969_v15 = vmax.f32 %v2906_v34, 0.0  ;;  %v2924_v8 = vadd.f32 %v5233_v56, %v2747_v39  ;;  %v2741_v46 = vadd.f32 %v2740_v30, %v6833_v49  ;;  %5345 = vmatprep.subr.mxu1 %v7641_v52  ;;  %v2941_v32 = vpop.f32.mrf.mxu1 }
 0x268   : > { %v6909_v12 = vsub.f32 %v3003_v33, %v6901_v35  ;;  %v6911_v10 = vand.u32 4294901760, %v3012_v61  ;;  %v5180_v58 = vpop.f32.mrf.mxu0  ;;  %5251 = vmatprep.mubr.f32.mxu0 %v3111_v57  ;;  %5289 = vmatprep.mubr.f32.mxu1 %v6901_v35  ;;  %v3130_v53 = vsub.f32 %v6885_v21, %v3129_v62  ;;  %v3139_v56 = vand.u32 4294901760, %v6876_v54 }
 0x269   : > { %v3009_v49 = vsel %vm385_vm0, %v2969_v15, 0  ;;  %v2972_v5 = vmax.f32 %v2924_v8, 0.0  ;;  %v2918_v28 = vadd.f32 %v2917_v36, %v2741_v46  ;;  %v2759_v0 = vadd.f32 %v5180_v58, %v6836_v50  ;;  %5252 = vmatmul.mubr.f32.vlgmr.msra.gmra.mxu0 %v3121_v7  ;;  %5290 = vmatmul.mubr.f32.gmra.mxu1 %v6887_v9  ;;  %v5242_v58 = vpop.f32.mrf.mxu1 }
 0x26a   : > { %v6922_v31 = vsub.f32 %v3012_v61, %v6911_v10  ;;  %v6924_v40 = vand.u32 4294901760, %v3009_v49  ;;  %5308 = vmatpush3.msra.mxu0 %v7642_v60  ;;  %v2752_v11 = vpop.f32.mrf.mxu0  ;;  %v3131_v14 = vand.u32 4294901760, %v3130_v53  ;;  %v3140_v22 = vsub.f32 %v6876_v54, %v3139_v56  ;;  %5346 = vmatpush3.msra.mxu1 %v7641_v52 }
 0x26b   : > { %v3018_v50 = vsel %vm385_vm0, %v2972_v5, 0  ;;  %v2971_v36 = vmax.f32 %v2918_v28, 0.0  ;;  %v2936_v24 = vadd.f32 %v5236_v3, %v2759_v0  ;;  %v2753_v1 = vadd.f32 %v2752_v11, %v6842_v51  ;;  %5309 = vmatprep.subr.mxu0 %v7643_v37  ;;  %5403 = vmatprep.subr.mxu1 %v7638_v55  ;;  %v7645_v28 = vld [vmem:[#allocation11_spill] sm:$0xff] }
 0x26c   : > { %v6936_v6 = vsub.f32 %v3009_v49, %v6924_v40  ;;  %v6938_v59 = vand.u32 4294901760, %v3018_v50  ;;  %v5183_v19 = vpop.f32.mrf.mxu0  ;;  %5254 = vmatprep.mubr.f32.mxu0 %v3131_v14  ;;  %5292 = vmatprep.mubr.f32.mxu1 %v6924_v40  ;;  %v3141_v27 = vand.u32 4294901760, %v3140_v22  ;;  %v3149_v7 = vand.u32 4294901760, %v6909_v12 }
 0x26d   : > { %v3015_v3 = vsel %vm385_vm0, %v2971_v36, 0  ;;  %v2974_v51 = vmax.f32 %v2936_v24, 0.0  ;;  %v2930_v48 = vadd.f32 %v2929_v13, %v2753_v1  ;;  %v2771_v29 = vadd.f32 %v5183_v19, %v6845_v43  ;;  %5293 = vmatmul.mubr.f32.gmra.mxu1 %v6911_v10  ;;  %5310 = vmatpush3.msra.mxu0 %v7643_v37  ;;  %v7644_v13 = vld [vmem:[#allocation54_spill] sm:$0xff] }
 0x26e   : > { %v6947_v33 = vsub.f32 %v3018_v50, %v6938_v59  ;;  %v6949_v38 = vand.u32 4294901760, %v3015_v3  ;;  %5255 = vmatmul.mubr.f32.gmra.mxu0 %v3141_v27  ;;  %v2764_v34 = vpop.f32.mrf.mxu0  ;;  %v3150_v39 = vsub.f32 %v6909_v12, %v3149_v7  ;;  %v3159_v30 = vand.u32 4294901760, %v6899_v63  ;;  %5311 = vmatprep.subr.mxu0 %v7644_v13  ;;  %v7646_v24 = vld [vmem:[#allocation6_spill] sm:$0xff]  ;;  %v2953_v27 = vpop.f32.mrf.mxu1 }
 0x26f   : > { %v3024_v43 = vsel %vm385_vm0, %v2974_v51, 0  ;;  %v2973_v57 = vmax.f32 %v2930_v48, 0.0  ;;  %v2948_v61 = vadd.f32 %v5239_v17, %v2771_v29  ;;  %v2765_v15 = vadd.f32 %v2764_v34, %v6854_v4  ;;  %5312 = vmatpush3.msra.mxu0 %v7644_v13 }
 0x270   : > { %v6960_v8 = vsub.f32 %v3015_v3, %v6949_v38  ;;  %v6962_v46 = vand.u32 4294901760, %v3024_v43  ;;  %v5186_v53 = vpop.f32.mrf.mxu0  ;;  %v3151_v49 = vand.u32 4294901760, %v3150_v39  ;;  %5295 = vmatprep.mubr.f32.mxu1 %v6949_v38  ;;  %v3160_v5 = vsub.f32 %v6899_v63, %v3159_v30  ;;  %5313 = vmatprep.subr.mxu0 %v7645_v28 }
 0x271   : > { %v3021_v4 = vsel %vm385_vm0, %v2973_v57, 0  ;;  %v2976_v17 = vmax.f32 %v2948_v61, 0.0  ;;  %v2942_v0 = vadd.f32 %v2941_v32, %v2765_v15  ;;  %v2783_v60 = vadd.f32 %v5186_v53, %v6857_v41  ;;  %5296 = vmatmul.mubr.f32.gmra.mxu1 %v6938_v59  ;;  %5314 = vmatpush3.msra.mxu0 %v7645_v28 }
 0x272   : > { %v6974_v11 = vsub.f32 %v3024_v43, %v6962_v46  ;;  %v6976_v14 = vand.u32 4294901760, %v3021_v4  ;;  %5257 = vmatprep.mubr.f32.mxu0 %v3151_v49  ;;  %v3161_v22 = vand.u32 4294901760, %v3160_v5  ;;  %v2776_v50 = vpop.f32.mrf.mxu0  ;;  %v3169_v36 = vand.u32 4294901760, %v6936_v6  ;;  %5371 = vmatprep.subr.mxu0 %v7646_v24 }
 0x273   : > { %v3030_v1 = vsel %vm385_vm0, %v2976_v17, 0  ;;  %v2975_v37 = vmax.f32 %v2942_v0, 0.0  ;;  %v2960_v41 = vadd.f32 %v5242_v58, %v2783_v60  ;;  %v2777_v32 = vadd.f32 %v2776_v50, %v6868_v16 }
 0x274   : > { %v6983_v19 = vsub.f32 %v3021_v4, %v6976_v14  ;;  %v6985_v3 = vand.u32 4294901760, %v3030_v1  ;;  %5258 = vmatmul.mubr.f32.gmra.mxu0 %v3161_v22  ;;  %v3170_v51 = vsub.f32 %v6936_v6, %v3169_v36  ;;  %5298 = vmatprep.mubr.f32.mxu1 %v6976_v14  ;;  %v3179_v48 = vand.u32 4294901760, %v6922_v31 }
 0x275   : > { %v3027_v29 = vsel %vm385_vm0, %v2975_v37, 0  ;;  %v2978_v34 = vmax.f32 %v2960_v41, 0.0  ;;  %v2954_v39 = vadd.f32 %v2953_v27, %v2777_v32  ;;  %5299 = vmatmul.mubr.f32.gmra.mxu1 %v6962_v46  ;;  %v3189_v16 = vand.u32 4294901760, %v6960_v8 }
 0x276   : > { %v6996_v13 = vsub.f32 %v3030_v1, %v6985_v3  ;;  %v6998_v43 = vand.u32 4294901760, %v3027_v29  ;;  %v3171_v57 = vand.u32 4294901760, %v3170_v51  ;;  %v3180_v61 = vsub.f32 %v6922_v31, %v3179_v48 }
 0x277   : > { %v3036_v15 = vsel %vm385_vm0, %v2978_v34, 0  ;;  %v2977_v58 = vmax.f32 %v2954_v39, 0.0  ;;  %v3190_v53 = vsub.f32 %v6960_v8, %v3189_v16  ;;  %v3199_v49 = vand.u32 4294901760, %v6947_v33 }
 0x278   : > { %v7009_v5 = vsub.f32 %v3027_v29, %v6998_v43  ;;  %v7011_v28 = vand.u32 4294901760, %v3036_v15  ;;  %5260 = vmatprep.mubr.f32.mxu0 %v3171_v57  ;;  %v3181_v4 = vand.u32 4294901760, %v3180_v61  ;;  %5301 = vmatprep.mubr.f32.mxu1 %v6998_v43  ;;  %v3209_v17 = vand.u32 4294901760, %v6983_v19 }
 0x279   : > { %v3033_v0 = vsel %vm385_vm0, %v2977_v58, 0  ;;  %v3191_v60 = vand.u32 4294901760, %v3190_v53  ;;  %v3200_v22 = vsub.f32 %v6947_v33, %v3199_v49  ;;  %5302 = vmatmul.mubr.f32.gmra.mxu1 %v6985_v3  ;;  %v3219_v50 = vand.u32 4294901760, %v6974_v11 }
 0x27a   : > { %v7021_v1 = vand.u32 4294901760, %v3033_v0  ;;  %5261 = vmatmul.mubr.f32.gmra.mxu0 %v3181_v4  ;;  %v3210_v37 = vsub.f32 %v6983_v19, %v3209_v17  ;;  %v3229_v41 = vand.u32 4294901760, %v7009_v5  ;;  %v7026_v32 = vsub.f32 %v3036_v15, %v7011_v28 }
 0x27b   : > { %5263 = vmatprep.mubr.f32.mxu0 %v3191_v60  ;;  %v3201_v27 = vand.u32 4294901760, %v3200_v22  ;;  %v3220_v51 = vsub.f32 %v6974_v11, %v3219_v50  ;;  %v3239_v57 = vand.u32 4294901760, %v6996_v13 }
 0x27c   : > { %v7030_v29 = vsub.f32 %v3033_v0, %v7021_v1  ;;  %v3211_v34 = vand.u32 4294901760, %v3210_v37  ;;  %5304 = vmatprep.mubr.f32.mxu1 %v7021_v1  ;;  %v3230_v39 = vsub.f32 %v7009_v5, %v3229_v41  ;;  %v3259_v0 = vand.u32 4294901760, %v7026_v32 }
 0x27d   : > { %5305 = vmatmul.mubr.f32.gmra.mxu1 %v7011_v28  ;;  %v3221_v58 = vand.u32 4294901760, %v3220_v51  ;;  %v3240_v53 = vsub.f32 %v6996_v13, %v3239_v57 }
 0x27e   : > { %5264 = vmatmul.mubr.f32.gmra.mxu0 %v3201_v27  ;;  %5347 = vmatprep.mubr.f32.mxu1 %v3109_v23  ;;  %v3249_v61 = vand.u32 4294901760, %v7030_v29  ;;  %v3231_v15 = vand.u32 4294901760, %v3230_v39  ;;  %v3260_v22 = vsub.f32 %v7026_v32, %v3259_v0 }
 0x27f   : > { %5266 = vmatprep.mubr.f32.mxu0 %v3211_v34  ;;  %v3241_v60 = vand.u32 4294901760, %v3240_v53 }
 0x280   : > { %v3250_v4 = vsub.f32 %v7030_v29, %v3249_v61 }
 0x281   : > { %5348 = vmatmul.mubr.f32.vlgmr.msra.gmra.mxu1 %v3119_v44  ;;  %v3261_v44 = vand.u32 4294901760, %v3260_v22 }
 0x282   : > { %5267 = vmatmul.mubr.f32.gmra.mxu0 %v3221_v58  ;;  %5350 = vmatprep.mubr.f32.mxu1 %v3129_v62  ;;  %v3251_v23 = vand.u32 4294901760, %v3250_v4 }
 0x283   : > { %5269 = vmatprep.mubr.f32.mxu0 %v3231_v15  ;;  %5404 = vmatpush3.msra.mxu1 %v7638_v55  ;;  %v7647_v55 = vld [vmem:[#allocation15_spill] sm:$0xff] }
 0x284   : > { %5405 = vmatprep.subr.mxu1 %v7639_v20 }
 0x285   : > { %5351 = vmatmul.mubr.f32.gmra.mxu1 %v3139_v56 }
 0x286   : > { %5270 = vmatmul.mubr.f32.gmra.mxu0 %v3241_v60  ;;  %5353 = vmatprep.mubr.f32.mxu1 %v3149_v7 }
 0x287   : > { %5272 = vmatprep.mubr.f32.mxu0 %v3251_v23  ;;  %5406 = vmatpush3.msra.mxu1 %v7639_v20  ;;  %v7213_v23 = vld [vmem:[#allocation3] ss:$0 sm:$0xff] }
 0x288   : > { %5407 = vmatprep.subr.mxu1 %v7640_v45 }
 0x289   : > { %5354 = vmatmul.mubr.f32.gmra.mxu1 %v3159_v30 }
 0x28a   : > { %5273 = vmatmul.mubr.f32.gmra.mxu0 %v3261_v44  ;;  %5356 = vmatprep.mubr.f32.mxu1 %v3169_v36 }
 0x28b   : > { %5315 = vmatprep.mubr.f32.mxu0 %v6862_v25  ;;  %5408 = vmatpush3.msra.mxu1 %v7640_v45  ;;  %v7649_v25 = vld [vmem:[#allocation53_spill] sm:$0xff] }
 0x28c   : > { %5409 = vmatprep.subr.mxu1 %v7641_v52 }
 0x28d   : > { %5357 = vmatmul.mubr.f32.gmra.mxu1 %v3179_v48 }
 0x28e   : > { %5316 = vmatmul.mubr.f32.vlgmr.msra.gmra.mxu0 %v6849_v26  ;;  %5359 = vmatprep.mubr.f32.mxu1 %v3189_v16  ;;  %v7648_v26 = vld [vmem:[#allocation17_spill] sm:$0xff] }
 0x28f   : > { %5372 = vmatpush3.msra.mxu0 %v7646_v24  ;;  %5318 = vmatprep.mubr.f32.mxu0 %v6885_v21 }
 0x290   : > { %5373 = vmatprep.subr.mxu0 %v7647_v55  ;;  %5410 = vmatpush3.msra.mxu1 %v7641_v52 }
 0x291   : > { %5360 = vmatmul.mubr.f32.gmra.mxu1 %v3199_v49  ;;  %5374 = vmatpush3.msra.mxu0 %v7647_v55 }
 0x292   : > { %5319 = vmatmul.mubr.f32.gmra.mxu0 %v6876_v54  ;;  %5362 = vmatprep.mubr.f32.mxu1 %v3209_v17 }
 0x293   : > { %5321 = vmatprep.mubr.f32.mxu0 %v6909_v12  ;;  %5375 = vmatprep.subr.mxu0 %v7648_v26 }
 0x294   : > { %5376 = vmatpush3.msra.mxu0 %v7648_v26 }
 0x295   : > { %5363 = vmatmul.mubr.f32.gmra.mxu1 %v3219_v50  ;;  %5377 = vmatprep.subr.mxu0 %v7649_v25 }
 0x296   : > { %5322 = vmatmul.mubr.f32.gmra.mxu0 %v6899_v63  ;;  %5365 = vmatprep.mubr.f32.mxu1 %v3229_v41 }
 0x297   : > { %5324 = vmatprep.mubr.f32.mxu0 %v6936_v6  ;;  %5378 = vmatpush3.msra.mxu0 %v7649_v25 }
 0x299   : > { %5366 = vmatmul.mubr.f32.gmra.mxu1 %v3239_v57 }
 0x29a   : > { %5325 = vmatmul.mubr.f32.gmra.mxu0 %v6922_v31  ;;  %5368 = vmatprep.mubr.f32.mxu1 %v3249_v61 }
 0x29b   : > { %5327 = vmatprep.mubr.f32.mxu0 %v6960_v8 }
 0x29d   : > { %5369 = vmatmul.mubr.f32.gmra.mxu1 %v3259_v0 }
 0x29e   : > { %5328 = vmatmul.mubr.f32.gmra.mxu0 %v6947_v33  ;;  %5411 = vmatprep.mubr.f32.mxu1 %v6851_v18 }
 0x29f   : > { %5330 = vmatprep.mubr.f32.mxu0 %v6983_v19 }
 0x2a1   : > { %5412 = vmatmul.mubr.f32.vlgmr.msra.gmra.mxu1 %v6839_v2 }
 0x2a2   : > { %5331 = vmatmul.mubr.f32.gmra.mxu0 %v6974_v11  ;;  %5414 = vmatprep.mubr.f32.mxu1 %v6878_v47 }
 0x2a3   : > { %5333 = vmatprep.mubr.f32.mxu0 %v7009_v5 }
 0x2a5   : > { %5415 = vmatmul.mubr.f32.gmra.mxu1 %v6864_v42 }
 0x2a6   : > { %5334 = vmatmul.mubr.f32.gmra.mxu0 %v6996_v13  ;;  %5417 = vmatprep.mubr.f32.mxu1 %v6901_v35 }
 0x2a7   : > { %5336 = vmatprep.mubr.f32.mxu0 %v7030_v29 }
 0x2a9   : > { %5418 = vmatmul.mubr.f32.gmra.mxu1 %v6887_v9 }
 0x2aa   : > { %5337 = vmatmul.mubr.f32.gmra.mxu0 %v7026_v32  ;;  %5420 = vmatprep.mubr.f32.mxu1 %v6924_v40 }
 0x2ab   : > { %5379 = vmatprep.mubr.f32.mxu0 %v6851_v18 }
 0x2ad   : > { %5421 = vmatmul.mubr.f32.gmra.mxu1 %v6911_v10 }
 0x2ae   : > { %5380 = vmatmul.mubr.f32.vlgmr.msra.gmra.mxu0 %v6839_v2  ;;  %5423 = vmatprep.mubr.f32.mxu1 %v6949_v38 }
 0x2af   : > { %5382 = vmatprep.mubr.f32.mxu0 %v6878_v47 }
 0x2b1   : > { %5424 = vmatmul.mubr.f32.gmra.mxu1 %v6938_v59 }
 0x2b2   : > { %5383 = vmatmul.mubr.f32.gmra.mxu0 %v6864_v42  ;;  %5426 = vmatprep.mubr.f32.mxu1 %v6976_v14 }
 0x2b3   : > { %5385 = vmatprep.mubr.f32.mxu0 %v6901_v35 }
 0x2b5   : > { %5427 = vmatmul.mubr.f32.gmra.mxu1 %v6962_v46 }
 0x2b6   : > { %5386 = vmatmul.mubr.f32.gmra.mxu0 %v6887_v9  ;;  %5429 = vmatprep.mubr.f32.mxu1 %v6998_v43 }
 0x2b7   : > { %5388 = vmatprep.mubr.f32.mxu0 %v6924_v40 }
 0x2b9   : > { %5430 = vmatmul.mubr.f32.gmra.mxu1 %v6985_v3 }
 0x2ba   : > { %5389 = vmatmul.mubr.f32.gmra.mxu0 %v6911_v10  ;;  %5432 = vmatprep.mubr.f32.mxu1 %v7021_v1 }
 0x2bb   : > { %5391 = vmatprep.mubr.f32.mxu0 %v6949_v38 }
 0x2bd   : > { %5433 = vmatmul.mubr.f32.gmra.mxu1 %v7011_v28 }
 0x2be   : > { %5392 = vmatmul.mubr.f32.gmra.mxu0 %v6938_v59 }
 0x2bf   : > { %5394 = vmatprep.mubr.f32.mxu0 %v6976_v14 }
 0x2c2   : > { %5395 = vmatmul.mubr.f32.gmra.mxu0 %v6962_v46 }
 0x2c3   : > { %5397 = vmatprep.mubr.f32.mxu0 %v6998_v43 }
 0x2c6   : > { %5398 = vmatmul.mubr.f32.gmra.mxu0 %v6985_v3 }
 0x2c7   : > { %5400 = vmatprep.mubr.f32.mxu0 %v7021_v1 }
 0x2ca   : > { %5401 = vmatmul.mubr.f32.gmra.mxu0 %v7011_v28 }
 0x321   : > { %v7123_v2 = vpop.f32.mrf.mxu1 }
 0x323   : > { %v7125_v18 = vpop.f32.mrf.mxu1 }
 0x325   : > { %v7127_v42 = vpop.f32.mrf.mxu1 }
 0x327   : > { %v7129_v54 = vpop.f32.mrf.mxu1 }
 0x329   : > { %v5253_v47 = vpop.f32.mrf.mxu0  ;;  %v7131_v20 = vpop.f32.mrf.mxu1 }
 0x32a   : > { %v3124_v55 = vadd.f32 %v5253_v47, %v7213_v23 }
 0x32b   : > { %v3113_v21 = vpop.f32.mrf.mxu0  ;;  %v7133_v9 = vpop.f32.mrf.mxu1 }
 0x32d   : > { %v7135_v45 = vpop.f32.mrf.mxu1 }
 0x32e   : > { %v5256_v63 = vpop.f32.mrf.mxu0 }
 0x32f   : > { %v7137_v35 = vpop.f32.mrf.mxu1 }
 0x330   : > { %v3133_v62 = vpop.f32.mrf.mxu0 }
 0x331   : > { %v7139_v52 = vpop.f32.mrf.mxu1 }
 0x333   : > { %v7141_v12 = vpop.f32.mrf.mxu1 }
 0x334   : > { %v5259_v10 = vpop.f32.mrf.mxu0 }
 0x335   : > { %v7143_v56 = vpop.f32.mrf.mxu1 }
 0x336   : > { %v7145_v31 = vpop.f32.mrf.mxu0 }
 0x337   : > { %v7147_v40 = vpop.f32.mrf.mxu1 }
 0x339   : > { %v7149_v6 = vpop.f32.mrf.mxu1 }
 0x33a   : > { %7650 = vst [vmem:[#allocation42_spill] sm:$0xff] %v7149_v6  ;;  %v7151_v59 = vpop.f32.mrf.mxu0 }
 0x33b   : > { %v7153_v7 = vpop.f32.mrf.mxu1 }
 0x33c   : > { %7651 = vst [vmem:[#allocation34_spill] sm:$0xff] %v7153_v7  ;;  %v7155_v33 = vpop.f32.mrf.mxu0 }
 0x33d   : > { %v7157_v38 = vpop.f32.mrf.mxu1 }
 0x33e   : > { %7652 = vst [vmem:[#allocation45_spill] sm:$0xff] %v7157_v38  ;;  %v7159_v30 = vpop.f32.mrf.mxu0 }
 0x33f   : > { %v7161_v8 = vpop.f32.mrf.mxu1 }
 0x340   : > { %7653 = vst [vmem:[#allocation38_spill] sm:$0xff] %v7161_v8  ;;  %v7163_v46 = vpop.f32.mrf.mxu0  ;;  %v3144_v8 = vadd.f32 %v5256_v63, %v7213_v23 }
 0x341   : > { %v5349_v11 = vpop.f32.mrf.mxu1 }
 0x342   : > { %v7165_v14 = vpop.f32.mrf.mxu0 }
 0x343   : > { %v7167_v36 = vpop.f32.mrf.mxu1 }
 0x344   : > { %v7169_v24 = vpop.f32.mrf.mxu0 }
 0x345   : > { %v7171_v19 = vpop.f32.mrf.mxu1 }
 0x346   : > { %v7173_v3 = vpop.f32.mrf.mxu0 }
 0x347   : > { %v7175_v48 = vpop.f32.mrf.mxu1 }
 0x348   : > { %v7177_v16 = vpop.f32.mrf.mxu0 }
 0x349   : > { %v7179_v13 = vpop.f32.mrf.mxu1 }
 0x34a   : > { %v7181_v43 = vpop.f32.mrf.mxu0 }
 0x34b   : > { %v7183_v49 = vpop.f32.mrf.mxu1 }
 0x34c   : > { %v7185_v5 = vpop.f32.mrf.mxu0 }
 0x34d   : > { %7654 = vst [vmem:[#allocation48_spill] sm:$0xff] %v7185_v5  ;;  %v7187_v28 = vpop.f32.mrf.mxu1 }
 0x34e   : > { %v5317_v17 = vpop.f32.mrf.mxu0 }
 0x34f   : > { %v7189_v50 = vpop.f32.mrf.mxu1 }
 0x350   : > { %v3524_v1 = vpop.f32.mrf.mxu0 }
 0x351   : > { %v7191_v37 = vpop.f32.mrf.mxu1 }
 0x352   : > { %v5320_v41 = vpop.f32.mrf.mxu0 }
 0x353   : > { %v7193_v32 = vpop.f32.mrf.mxu1 }
 0x354   : > { %7655 = vst [vmem:[#allocation41_spill] sm:$0xff] %v7193_v32  ;;  %v3538_v27 = vpop.f32.mrf.mxu0 }
 0x355   : > { %v7195_v51 = vpop.f32.mrf.mxu1 }
 0x356   : > { %7656 = vst [vmem:[#allocation44_spill] sm:$0xff] %v7195_v51  ;;  %v5323_v29 = vpop.f32.mrf.mxu0  ;;  %v3134_v51 = vadd.f32 %v7213_v23, %v3133_v62 }
 0x357   : > { %v7197_v34 = vpop.f32.mrf.mxu1 }
 0x358   : > { %7657 = vst [vmem:[#allocation47_spill] sm:$0xff] %v7197_v34  ;;  %v3552_v39 = vpop.f32.mrf.mxu0 }
 0x359   : > { %v7199_v57 = vpop.f32.mrf.mxu1 }
 0x35a   : > { %7658 = vst [vmem:[#allocation50_spill] sm:$0xff] %v7199_v57  ;;  %v7201_v61 = vpop.f32.mrf.mxu0 }
 0x35b   : > { %v7203_v15 = vpop.f32.mrf.mxu1 }
 0x35c   : > { %7659 = vst [vmem:[#allocation7_spill] sm:$0xff] %v7203_v15  ;;  %v7205_v58 = vpop.f32.mrf.mxu0  ;;  %v3114_v15 = vadd.f32 %v7213_v23, %v3113_v21  ;;  %v3164_v21 = vadd.f32 %v5259_v10, %v7213_v23  ;;  %v3184_v10 = vadd.f32 %v7151_v59, %v7213_v23 }
 0x35d   : > { %v7207_v53 = vpop.f32.mrf.mxu1 }
 0x35e   : > { %7660 = vst [vmem:[#allocation10_spill] sm:$0xff] %v7207_v53  ;;  %v7209_v4 = vpop.f32.mrf.mxu0  ;;  %v3355_v47 = vadd.f32 %v7125_v18, %v3114_v15 }
 0x35f   : > { %v7211_v0 = vpop.f32.mrf.mxu1 }
 0x360   : > { %7661 = vst [vmem:[#allocation13_spill] sm:$0xff] %v7211_v0  ;;  %v7215_v60 = vpop.f32.mrf.mxu0  ;;  %v3361_v0 = vadd.f32 %v7123_v2, %v3124_v55  ;;  %v3154_v2 = vadd.f32 %v7213_v23, %v7145_v31  ;;  %v3174_v31 = vadd.f32 %v7213_v23, %v7155_v33  ;;  %v3204_v33 = vadd.f32 %v7159_v30, %v7213_v23 }
 0x361   : > { %v5413_v22 = vpop.f32.mrf.mxu1 }
 0x362   : > { %v7217_v44 = vpop.f32.mrf.mxu0  ;;  %v3532_v7 = vadd.f32 %v5317_v17, %v3361_v0  ;;  %v3367_v17 = vadd.f32 %v7129_v54, %v3134_v51  ;;  %v3379_v54 = vadd.f32 %v7133_v9, %v3154_v2  ;;  %v3397_v9 = vadd.f32 %v7135_v45, %v3184_v10 }
 0x363   : > { %v4074_v26 = vpop.f32.mrf.mxu1 }
 0x364   : > { %v7220_v25 = vpop.f32.mrf.mxu0  ;;  %v3715_v18 = vadd.f32 %v5349_v11, %v3532_v7  ;;  %v3539_v0 = vadd.f32 %v3538_v27, %v3367_v17  ;;  %v3553_v51 = vadd.f32 %v3552_v39, %v3379_v54  ;;  %v3574_v30 = vadd.f32 %v7201_v61, %v3397_v9 }
 0x365   : > { %7662 = vst [vmem:[#allocation16_spill] sm:$0xff] %v7220_v25  ;;  %v5416_v57 = vpop.f32.mrf.mxu1  ;;  %v3525_v25 = vadd.f32 %v3524_v1, %v3355_v47 }
 0x366   : > { %v7223_v53 = vpop.f32.mrf.mxu0 }
 0x367   : > { %7663 = vst [vmem:[#allocation21_spill] sm:$0xff] %v7223_v53  ;;  %v4086_v34 = vpop.f32.mrf.mxu1  ;;  %v3373_v53 = vadd.f32 %v7127_v42, %v3144_v8  ;;  %v3385_v42 = vadd.f32 %v7131_v20, %v3164_v21  ;;  %v3707_v55 = vadd.f32 %v7167_v36, %v3525_v25 }
 0x368   : > { %v7227_v38 = vpop.f32.mrf.mxu0 }
 0x369   : > { %v5419_v5 = vpop.f32.mrf.mxu1  ;;  %v3546_v62 = vadd.f32 %v5320_v41, %v3373_v53  ;;  %v3560_v20 = vadd.f32 %v5323_v29, %v3385_v42  ;;  %v3723_v29 = vadd.f32 %v7175_v48, %v3539_v0  ;;  %v3409_v48 = vadd.f32 %v7139_v52, %v3204_v33  ;;  %v7668_v33 = vld [vmem:[#allocation34_spill] sm:$0xff] }
 0x36a   : > { %v7231_v32 = vpop.f32.mrf.mxu0 }
 0x36b   : > { %v7235_v6 = vpop.f32.mrf.mxu1  ;;  %v3731_v36 = vadd.f32 %v7171_v19, %v3546_v62  ;;  %v3391_v19 = vadd.f32 %v7137_v35, %v3174_v31  ;;  %v3747_v2 = vadd.f32 %v7179_v13, %v3560_v20  ;;  %v3264_v31 = vadd.f32 %v7181_v43, %v7213_v23 }
 0x36c   : > { %v7239_v63 = vpop.f32.mrf.mxu0  ;;  %v7665_v20 = vld [vmem:[#allocation16_spill] sm:$0xff] }
 0x36d   : > { %v7242_v15 = vpop.f32.mrf.mxu1 }
 0x36e   : > { %v5381_v1 = vpop.f32.mrf.mxu0 }
 0x36f   : > { %v3916_v8 = vadd.f32 %v5381_v1, %v3715_v18  ;;  %v7248_v47 = vpop.f32.mrf.mxu1  ;;  %v3214_v18 = vadd.f32 %v7213_v23, %v7169_v24  ;;  %v3763_v1 = vadd.f32 %v7187_v28, %v3574_v30  ;;  %v3234_v28 = vadd.f32 %v7213_v23, %v7177_v16 }
 0x370   : > { %v3909_v59 = vpop.f32.mrf.mxu0 }
 0x371   : > { %v4081_v7 = vadd.f32 %v5413_v22, %v3916_v8  ;;  %v3910_v11 = vadd.f32 %v3909_v59, %v3707_v55  ;;  %v5425_v27 = vpop.f32.mrf.mxu1  ;;  %v3194_v22 = vadd.f32 %v7213_v23, %v7163_v46  ;;  %v3567_v46 = vadd.f32 %v7205_v58, %v3391_v19  ;;  %v7671_v19 = vld [vmem:[#allocation45_spill] sm:$0xff] }
 0x372   : > { %v5384_v41 = vpop.f32.mrf.mxu0  ;;  %v3415_v8 = vadd.f32 %v7147_v40, %v3214_v18  ;;  %v3427_v9 = vadd.f32 %v7668_v33, %v3234_v28 }
 0x373   : > { %4170 = vst.msk [vmem:[%s7258_s29 + $0x8] sm:$0xff] %vm4168_vm1, %v4081_v7  ;;  %v4075_v53 = vadd.f32 %v4074_v26, %v3910_v11  ;;  %v3928_v25 = vadd.f32 %v5384_v41, %v3731_v36  ;;  %v3224_v26 = vadd.f32 %v7165_v14, %v7213_v23  ;;  %v4122_v17 = vpop.f32.mrf.mxu1  ;;  %v3403_v13 = vadd.f32 %v7141_v12, %v3194_v22  ;;  %v7667_v36 = vld [vmem:[#allocation48_spill] sm:$0xff]  ;;  %v7669_v41 = vld [vmem:[#allocation21_spill] sm:$0xff] }
 0x374   : > { %v3921_v21 = vpop.f32.mrf.mxu0  ;;  %v3588_v14 = vadd.f32 %v7209_v4, %v3409_v48  ;;  %v3595_v40 = vadd.f32 %v7665_v20, %v3415_v8  ;;  %v7673_v48 = vld [vmem:[#allocation38_spill] sm:$0xff] }
 0x375   : > { %4169 = vst.msk [vmem:[%s7258_s29] sm:$0xff] %vm4168_vm1, %v4075_v53  ;;  %v4093_v45 = vadd.f32 %v5416_v57, %v3928_v25  ;;  %v3922_v39 = vadd.f32 %v3921_v21, %v3723_v29  ;;  %v3739_v57 = vadd.f32 %v7183_v49, %v3553_v51  ;;  %v3421_v49 = vadd.f32 %v7143_v56, %v3224_v26  ;;  %v5428_v42 = vpop.f32.mrf.mxu1  ;;  %v7670_v29 = vld [vmem:[#allocation44_spill] sm:$0xff] }
 0x376   : > { %v5387_v62 = vpop.f32.mrf.mxu0  ;;  %v3581_v24 = vadd.f32 %v7215_v60, %v3403_v13 }
 0x377   : > { %4172 = vst.msk [vmem:[%s7258_s29 + $0x18] sm:$0xff] %vm4168_vm1, %v4093_v45  ;;  %v4087_v35 = vadd.f32 %v4086_v34, %v3922_v39  ;;  %v3940_v61 = vadd.f32 %v5387_v62, %v3747_v2  ;;  %v3244_v34 = vadd.f32 %v7173_v3, %v7213_v23  ;;  %v3602_v56 = vadd.f32 %v7217_v44, %v3421_v49  ;;  %v4134_v59 = vpop.f32.mrf.mxu1  ;;  %v7672_v2 = vld [vmem:[#allocation47_spill] sm:$0xff]  ;;  %v7676_v49 = vld [vmem:[#allocation10_spill] sm:$0xff] }
 0x378   : > { %v3933_v10 = vpop.f32.mrf.mxu0  ;;  %v3609_v45 = vadd.f32 %v7227_v38, %v3427_v9  ;;  %v3787_v26 = vadd.f32 %v7672_v2, %v3595_v40 }
 0x379   : > { %4171 = vst.msk [vmem:[%s7258_s29 + $0x10] sm:$0xff] %vm4168_vm1, %v4087_v35  ;;  %v4105_v52 = vadd.f32 %v5419_v5, %v3940_v61  ;;  %v3934_v58 = vadd.f32 %v3933_v10, %v3739_v57  ;;  %v3755_v5 = vadd.f32 %v7189_v50, %v3567_v46  ;;  %v7664_v50 = vld [vmem:[#allocation42_spill] sm:$0xff]  ;;  %v3795_v22 = vadd.f32 %v7670_v29, %v3602_v56  ;;  %v5431_v21 = vpop.f32.mrf.mxu1 }
 0x37a   : > { %v5390_v0 = vpop.f32.mrf.mxu0  ;;  %v3433_v54 = vadd.f32 %v7664_v50, %v3244_v34  ;;  %v7674_v57 = vld [vmem:[#allocation50_spill] sm:$0xff] }
 0x37b   : > { %4174 = vst.msk [vmem:[%s7258_s29 + $0x28] sm:$0xff] %vm4168_vm1, %v4105_v52  ;;  %v4099_v12 = vadd.f32 %v7235_v6, %v3934_v58  ;;  %v3952_v4 = vadd.f32 %v5390_v0, %v3763_v1  ;;  %v3779_v6 = vadd.f32 %v7191_v37, %v3588_v14  ;;  %v3254_v37 = vadd.f32 %v7213_v23, %v7667_v36  ;;  %v4146_v38 = vpop.f32.mrf.mxu1  ;;  %v7675_v52 = vld [vmem:[#allocation7_spill] sm:$0xff] }
 0x37c   : > { %v3945_v3 = vpop.f32.mrf.mxu0  ;;  %v3616_v51 = vadd.f32 %v7669_v41, %v3433_v54  ;;  %v3803_v58 = vadd.f32 %v7675_v52, %v3609_v45 }
 0x37d   : > { %4173 = vst.msk [vmem:[%s7258_s29 + $0x20] sm:$0xff] %vm4168_vm1, %v4099_v12  ;;  %v4117_v60 = vadd.f32 %v7242_v15, %v3952_v4  ;;  %v3946_v55 = vadd.f32 %v3945_v3, %v3755_v5  ;;  %v7666_v15 = vld [vmem:[#allocation41_spill] sm:$0xff]  ;;  %v3439_v62 = vadd.f32 %v7673_v48, %v3254_v37 }
 0x37e   : > { %v5393_v16 = vpop.f32.mrf.mxu0  ;;  %v3771_v11 = vadd.f32 %v7666_v15, %v3581_v24  ;;  %v3811_v18 = vadd.f32 %v7674_v57, %v3616_v51  ;;  %v7677_v4 = vld [vmem:[#allocation13_spill] sm:$0xff] }
 0x37f   : > { %4176 = vst.msk [vmem:[%s7258_s29 + $0x38] sm:$0xff] %vm4168_vm1, %v4117_v60  ;;  %v4111_v44 = vadd.f32 %v7248_v47, %v3946_v55  ;;  %v3964_v7 = vadd.f32 %v5393_v16, %v3779_v6  ;;  %v3445_v47 = vadd.f32 %v7671_v19, %v3264_v31 }
 0x380   : > { %v3957_v43 = vpop.f32.mrf.mxu0 }
 0x381   : > { %4175 = vst.msk [vmem:[%s7258_s29 + $0x30] sm:$0xff] %vm4168_vm1, %v4111_v44  ;;  %v4129_v53 = vadd.f32 %v5425_v27, %v3964_v7  ;;  %v3958_v25 = vadd.f32 %v3957_v43, %v3771_v11  ;;  %v3630_v46 = vadd.f32 %v7231_v32, %v3445_v47 }
 0x382   : > { %v5396_v30 = vpop.f32.mrf.mxu0 }
 0x383   : > { %4178 = vst.msk [vmem:[%s7258_s29 + $0x48] sm:$0xff] %vm4168_vm1, %v4129_v53  ;;  %v4123_v23 = vadd.f32 %v4122_v17, %v3958_v25  ;;  %v3976_v39 = vadd.f32 %v5396_v30, %v3795_v22  ;;  %v3623_v17 = vadd.f32 %v7239_v63, %v3439_v62  ;;  %v3827_v0 = vadd.f32 %v7676_v49, %v3630_v46 }
 0x384   : > { %v3969_v27 = vpop.f32.mrf.mxu0 }
 0x385   : > { %4177 = vst.msk [vmem:[%s7258_s29 + $0x40] sm:$0xff] %vm4168_vm1, %v4123_v23  ;;  %v4141_v35 = vadd.f32 %v5428_v42, %v3976_v39  ;;  %v3970_v61 = vadd.f32 %v3969_v27, %v3787_v26  ;;  %v5434_v42 = vpop.f32.mrf.mxu1  ;;  %v3819_v5 = vadd.f32 %v7677_v4, %v3623_v17 }
 0x386   : > { %v5399_v13 = vpop.f32.mrf.mxu0 }
 0x387   : > { %4180 = vst.msk [vmem:[%s7258_s29 + $0x58] sm:$0xff] %vm4168_vm1, %v4141_v35  ;;  %v4135_v10 = vadd.f32 %v4134_v59, %v3970_v61  ;;  %v3988_v14 = vadd.f32 %v5399_v13, %v3811_v18  ;;  %v4158_v56 = vpop.f32.mrf.mxu1 }
 0x388   : > { %v3981_v1 = vpop.f32.mrf.mxu0 }
 0x389   : > { %4179 = vst.msk [vmem:[%s7258_s29 + $0x50] sm:$0xff] %vm4168_vm1, %v4135_v10  ;;  %v4153_v32 = vadd.f32 %v5431_v21, %v3988_v14  ;;  %v3982_v34 = vadd.f32 %v3981_v1, %v3803_v58 }
 0x38a   : > { %v5402_v24 = vpop.f32.mrf.mxu0 }
 0x38b   : > { %4182 = vst.msk [vmem:[%s7258_s29 + $0x68] sm:$0xff] %vm4168_vm1, %v4153_v32  ;;  %v4147_v63 = vadd.f32 %v4146_v38, %v3982_v34  ;;  %v4000_v12 = vadd.f32 %v5402_v24, %v3827_v0 }
 0x38c   : > { %v3993_v28 = vpop.f32.mrf.mxu0 }
 0x38d   : > { %4181 = vst.msk [vmem:[%s7258_s29 + $0x60] sm:$0xff] %vm4168_vm1, %v4147_v63  ;;  %v4165_v8 = vadd.f32 %v5434_v42, %v4000_v12  ;;  %v3994_v3 = vadd.f32 %v3993_v28, %v3819_v5 }
 0x38f   : > { %4184 = vst.msk [vmem:[%s7258_s29 + $0x78] sm:$0xff] %vm4168_vm1, %v4165_v8  ;;  %v4159_v60 = vadd.f32 %v4158_v56, %v3994_v3 }
 0x391   : > { %4183 = vst.msk [vmem:[%s7258_s29 + $0x70] sm:$0xff] %vm4168_vm1, %v4159_v60 }
 0x392 PF: > { %s19_s28 = sadd.s32 1, %s5481_s28   ;;  %s7678_s26 = smov %s5477_s27 }
 0x393   : > { %p16_p5 = scmp.ge.s32.totalorder %s19_s28, 4   ;;  %s7679_s27 = smov %s7681_s6 }
 0x395   :  { %18 = sbr.rel (!%p16_p5) target bundleno = 3 (0x3), region = 89 }

</bundles_post_ra>
